<compile_context>
chip_gen: v7x
topology: tpu7x:2x2x1
jax: 0.10.0
libtpu: 0.0.40
codegen_flags: <defaults>
</compile_context>

<pallas_src>
import jax
import jax.numpy as jnp
from jax import lax
from jax.experimental import pallas as pl
from jax.experimental.pallas import tpu as pltpu


def make_attention_kernel(num_heads: int, head_dim: int, block_b: int,
                          seq_len: int):
    C = num_heads * head_dim
    N = seq_len
    M = block_b * N

    def kernel(x_ref, wqkv_ref, wproj_ref, bproj_ref, o_ref, ctx_ref):
        cdt = x_ref.dtype

        # (block_b, N, C) -> (M, C): leading-dim merge only (the wrapper only
        # packs block_b > 1 when N % 8 == 0, so this stays tile-aligned).
        x2 = x_ref[...].reshape(M, C)

        # Fused qkv projection: one big lane-dense MXU matmul, f32 accum.
        # The softmax scale is already folded into the q columns of wqkv.
        qkv = jnp.dot(x2, wqkv_ref[...],
                      preferred_element_type=jnp.float32)      # (M, 3C) f32
        qkv_c = qkv.astype(cdt)     # attention matmul operands: compute dtype
        q_all = qkv_c[:, :C]
        k_all = qkv_c[:, C:2 * C]
        v_all = qkv_c[:, 2 * C:]

        # Per-(image, head) scaled-dot-product attention.  Each head's (N, D)
        # context goes into the lane-contiguous (M, C) scratch so the output
        # projection below is one K=C contraction.
        # TODO(synk): for head_dim < 128 the per-head lane slices are sub-vreg
        # (masked loads); inherent to head_dim, second-order after MXU fixes.
        for b in range(block_b):
            r0 = b * N
            for h in range(num_heads):
                lo = h * head_dim
                hi = lo + head_dim
                qh = q_all[r0:r0 + N, lo:hi]                    # (N, D)
                kh = k_all[r0:r0 + N, lo:hi]                    # (N, D)
                vh = v_all[r0:r0 + N, lo:hi]                    # (N, D)

                # q @ k^T with the transpose absorbed into the contraction.
                s = lax.dot_general(
                    qh, kh,
                    dimension_numbers=(((1,), (1,)), ((), ())),
                    preferred_element_type=jnp.float32)         # (N, N) f32

                s = s - jnp.max(s, axis=-1, keepdims=True)
                p = jnp.exp(s)
                p = p * pl.reciprocal(jnp.sum(p, axis=-1, keepdims=True),
                                      approx=True)
                # TODO(synk): attn_drop is identity (p=0.0 / eval mode).

                ctx = jnp.dot(p.astype(cdt), vh,
                              preferred_element_type=jnp.float32)  # (N, D)
                ctx_ref[r0:r0 + N, lo:hi] = ctx.astype(cdt)

        # Output projection: ONE (M, C) @ (C, C) matmul with full K=C
        # contraction (vs. H small K=head_dim matmuls), f32 accumulation.
        y = jnp.dot(ctx_ref[...], wproj_ref[...],
                    preferred_element_type=jnp.float32)          # (M, C) f32
        y = y + bproj_ref[...]              # (1, C) bias broadcast, done once
        # TODO(synk): proj_drop is identity (p=0.0 / eval mode).
        o_ref[...] = y.reshape(block_b, N, C).astype(o_ref.dtype)

    return kernel


def attention_forward(x, w_qkv, w_proj, b_proj, num_heads, *,
                      block_b=None, compute_dtype=jnp.bfloat16,
                      single_buffer_weights=True):
    """x: (B, N, C); w_qkv: (3C, C) torch layout; w_proj: (C, C); b_proj: (C,).

    compute_dtype: operand dtype for the MXU matmuls (default bf16);
    accumulation is always f32 via preferred_element_type.
    """
    B, N, C = x.shape
    assert C % num_heads == 0
    head_dim = C // num_heads
    scale = head_dim ** (-0.5)

    # nn.Linear does x @ W.T, so pre-transpose once in the wrapper.  Fold the
    # softmax scale into the q columns of wqkv (in f32, before the cast) so
    # the kernel never does the per-head N x N VPU multiply.
    wqkv_t = jnp.transpose(w_qkv).astype(jnp.float32)            # (C, 3C)
    qk_scale = jnp.concatenate(
        [jnp.full((C,), scale, jnp.float32), jnp.ones((2 * C,), jnp.float32)])
    wqkv_t = (wqkv_t * qk_scale[None, :]).astype(compute_dtype)
    wproj_t = jnp.transpose(w_proj).astype(compute_dtype)        # (C, C)
    bproj2d = b_proj.reshape(1, C).astype(jnp.float32)           # added to f32
    x_c = x.astype(compute_dtype)
    # TODO(synk): on v7x the two projection matmuls could take fp8 weights.

    if block_b is None:
        block_b = 1
        if N % 8 == 0:
            # Pack images per grid step (bigger projection M-dim, fewer grid
            # steps) but keep the grid >= 2 so both v7x TensorCores get work.
            max_bb = max(1, B // 2)
            for bb in range(1, max_bb + 1):
                if B % bb == 0 and bb * N <= 512:
                    block_b = bb
    assert B % block_b == 0, "block_b must divide B"

    kernel = make_attention_kernel(num_heads, head_dim, block_b, N)

    # Explicit VMEM budget (with headroom) so large models don't silently
    # exceed the default scoped limit (16 MiB v5e / 32 MiB v6e, v7x).
    io_bytes = jnp.dtype(x.dtype).itemsize
    cdt_bytes = jnp.dtype(compute_dtype).itemsize
    wbuf = 1 if single_buffer_weights else 2
    vmem_est = (
        4 * block_b * N * C * io_bytes                       # x + out (2-buf)
        + wbuf * ((3 * C * C + C * C) * cdt_bytes + C * 4)   # weights + bias
        + block_b * N * C * cdt_bytes                        # ctx scratch
        + block_b * N * 3 * C * (4 + cdt_bytes)              # qkv f32 + cast
        + block_b * N * C * 8)                               # y + softmax tmp
    vmem_limit = int(min(max(2 * vmem_est, 16 * 2**20), 64 * 2**20))

    # Weights / bias have a constant block index across the grid: single
    # buffering halves their VMEM footprint at zero pipelining cost.
    weight_mode = (dict(pipeline_mode=pl.Buffered(buffer_count=1))
                   if single_buffer_weights else {})

    grid_spec = pltpu.PrefetchScalarGridSpec(
        num_scalar_prefetch=0,
        grid=(B // block_b,),
        in_specs=[
            pl.BlockSpec((block_b, N, C), lambda b: (b, 0, 0)),
            pl.BlockSpec((C, 3 * C), lambda b: (0, 0), **weight_mode),
            pl.BlockSpec((C, C), lambda b: (0, 0), **weight_mode),
            pl.BlockSpec((1, C), lambda b: (0, 0), **weight_mode),
        ],
        out_specs=pl.BlockSpec((block_b, N, C), lambda b: (b, 0, 0)),
        scratch_shapes=[pltpu.VMEM((block_b * N, C), compute_dtype)],
    )

    return pl.pallas_call(
        kernel,
        out_shape=jax.ShapeDtypeStruct((B, N, C), x.dtype),
        grid_spec=grid_spec,
        compiler_params=pltpu.CompilerParams(
            dimension_semantics=("parallel",),
            vmem_limit_bytes=vmem_limit,
        ),
    )(x_c, wqkv_t, wproj_t, bproj2d)


def attention_reference(x, w_qkv, w_proj, b_proj, num_heads):
    """Pure-JAX replica of the PyTorch forward (eval mode, qkv_bias=False)."""
    B, N, C = x.shape
    head_dim = C // num_heads
    scale = head_dim ** (-0.5)

    qkv = x @ w_qkv.T                                         # (B, N, 3C)
    qkv = qkv.reshape(B, N, 3, num_heads, head_dim)
    qkv = jnp.transpose(qkv, (2, 0, 3, 1, 4))                 # (3, B, H, N, D)
    q, k, v = qkv[0], qkv[1], qkv[2]
    attn = jnp.einsum("bhnd,bhmd->bhnm", q, k) * scale
    attn = jax.nn.softmax(attn, axis=-1)
    out = jnp.einsum("bhnm,bhmd->bhnd", attn, v)
    out = jnp.transpose(out, (0, 2, 1, 3)).reshape(B, N, C)
    return out @ w_proj.T + b_proj


if __name__ == "__main__":
    B, N, C = 2, 8, 32
    num_heads = 8

    key = jax.random.PRNGKey(0)
    kx, kqkv, kproj, kb = jax.random.split(key, 4)

    x = jax.random.normal(kx, (B, N, C), dtype=jnp.float32)
    # Deterministic parameter init (shapes follow nn.Linear: (out, in)).
    w_qkv = jax.random.normal(kqkv, (3 * C, C), dtype=jnp.float32) * 0.05
    w_proj = jax.random.normal(kproj, (C, C), dtype=jnp.float32) * 0.05
    b_proj = jax.random.normal(kb, (C,), dtype=jnp.float32) * 0.05

    def run(single_buffer_weights):
        o_bf16 = attention_forward(x, w_qkv, w_proj, b_proj, num_heads,
                                   single_buffer_weights=single_buffer_weights)
        o_f32 = attention_forward(x, w_qkv, w_proj, b_proj, num_heads,
                                  compute_dtype=jnp.float32,
                                  single_buffer_weights=single_buffer_weights)
        return jax.block_until_ready(o_bf16), jax.block_until_ready(o_f32)

    try:
        out_bf16, out_f32 = run(True)
    except Exception:
        # Fallback if this JAX build rejects pl.Buffered(1) single-buffering
        # of the weight BlockSpecs — numerics are identical either way.
        out_bf16, out_f32 = run(False)

    ref = attention_reference(x, w_qkv, w_proj, b_proj, num_heads)
    assert out_f32.shape == (B, N, C) and out_bf16.shape == (B, N, C)
    # f32 compute path: only the EUP approx reciprocal loosens the tolerance.
    assert jnp.allclose(out_f32, ref, atol=2e-3, rtol=2e-3), "f32 mismatch"
    # bf16 compute path (default): standard mixed-precision error budget.
    assert jnp.allclose(out_bf16, ref, atol=3e-2, rtol=3e-2), "bf16 mismatch"

    print("KERNEL_OK")
</pallas_src>

<mosaic_0001>
module attributes {stable_mosaic.version = 11 : i64} {
  func.func @kernel(%arg0: i32, %arg1: memref<1x8x32xbf16, #tpu.memory_space<vmem>>, %arg2: memref<32x96xbf16, #tpu.memory_space<vmem>>, %arg3: memref<32x32xbf16, #tpu.memory_space<vmem>>, %arg4: memref<1x32xf32, #tpu.memory_space<vmem>>, %arg5: memref<1x8x32xf32, #tpu.memory_space<vmem>>, %arg6: memref<8x32xbf16, #tpu.memory_space<vmem>>) attributes {dimension_semantics = [#tpu.dimension_semantics<parallel>], iteration_bounds = array<i64: 2>, scalar_prefetch = 0 : i64, scratch_operands = 1 : i64, tpu.core_type = #tpu.core_type<tc>, window_params = [{transform_indices = @transform_0, window_bounds = array<i64: 1, 8, 32>}, {pipeline_mode = #tpu.pipeline_mode<synchronous>, transform_indices = @transform_1, window_bounds = array<i64: 32, 96>}, {pipeline_mode = #tpu.pipeline_mode<synchronous>, transform_indices = @transform_2, window_bounds = array<i64: 32, 32>}, {pipeline_mode = #tpu.pipeline_mode<synchronous>, transform_indices = @transform_3, window_bounds = array<i64: 1, 32>}, {transform_indices = @transform_4, window_bounds = array<i64: 1, 8, 32>}]} {
    %c0 = arith.constant 0 : index
    %c0_0 = arith.constant 0 : index
    %c0_1 = arith.constant 0 : index
    %0 = vector.load %arg1[%c0, %c0_0, %c0_1] : memref<1x8x32xbf16, #tpu.memory_space<vmem>>, vector<1x8x32xbf16>
    %1 = vector.shape_cast %0 : vector<1x8x32xbf16> to vector<8x32xbf16>
    %c0_2 = arith.constant 0 : index
    %c0_3 = arith.constant 0 : index
    %2 = vector.load %arg2[%c0_2, %c0_3] : memref<32x96xbf16, #tpu.memory_space<vmem>>, vector<32x96xbf16>
    %cst = arith.constant dense<0.000000e+00> : vector<8x96xf32>
    %3 = tpu.matmul %1, %2, %cst {dimension_numbers = #tpu.dot_dimension_numbers<[1], [0], [0], [1], [0, 0, 1, 1], [], []>} : vector<8x32xbf16>, vector<32x96xbf16>, vector<8x96xf32> -> vector<8x96xf32>
    %4 = arith.truncf %3 : vector<8x96xf32> to vector<8x96xbf16>
    %5 = vector.extract_strided_slice %4 {offsets = [0, 0], sizes = [8, 32], strides = [1, 1]} : vector<8x96xbf16> to vector<8x32xbf16>
    %6 = vector.extract_strided_slice %4 {offsets = [0, 32], sizes = [8, 32], strides = [1, 1]} : vector<8x96xbf16> to vector<8x32xbf16>
    %7 = vector.extract_strided_slice %4 {offsets = [0, 64], sizes = [8, 32], strides = [1, 1]} : vector<8x96xbf16> to vector<8x32xbf16>
    %8 = vector.extract_strided_slice %5 {offsets = [0, 0], sizes = [8, 4], strides = [1, 1]} : vector<8x32xbf16> to vector<8x4xbf16>
    %9 = vector.extract_strided_slice %6 {offsets = [0, 0], sizes = [8, 4], strides = [1, 1]} : vector<8x32xbf16> to vector<8x4xbf16>
    %10 = vector.extract_strided_slice %7 {offsets = [0, 0], sizes = [8, 4], strides = [1, 1]} : vector<8x32xbf16> to vector<8x4xbf16>
    %cst_4 = arith.constant dense<0.000000e+00> : vector<8x8xf32>
    %11 = tpu.matmul %8, %9, %cst_4 {dimension_numbers = #tpu.dot_dimension_numbers<[1], [1], [0], [0], [0, 0, 1, 0], [], []>} : vector<8x4xbf16>, vector<8x4xbf16>, vector<8x8xf32> -> vector<8x8xf32>
    %cst_5 = arith.constant dense<0xFF800000> : vector<8xf32>
    %12 = vector.multi_reduction <maximumf>, %11, %cst_5 [1] : vector<8x8xf32> to vector<8xf32>
    %13 = vector.shape_cast %12 : vector<8xf32> to vector<8x1xf32>
    %14 = vector.broadcast %13 : vector<8x1xf32> to vector<8x8xf32>
    %15 = arith.subf %11, %14 : vector<8x8xf32>
    %16 = math.exp %15 : vector<8x8xf32>
    %cst_6 = arith.constant dense<0.000000e+00> : vector<8xf32>
    %17 = vector.multi_reduction <add>, %16, %cst_6 [1] : vector<8x8xf32> to vector<8xf32>
    %18 = vector.shape_cast %17 : vector<8xf32> to vector<8x1xf32>
    %19 = tpu.reciprocal %18 {approx = true} : vector<8x1xf32> -> vector<8x1xf32>
    %20 = vector.broadcast %19 : vector<8x1xf32> to vector<8x8xf32>
    %21 = arith.mulf %16, %20 : vector<8x8xf32>
    %22 = arith.truncf %21 : vector<8x8xf32> to vector<8x8xbf16>
    %cst_7 = arith.constant dense<0.000000e+00> : vector<8x4xf32>
    %23 = tpu.matmul %22, %10, %cst_7 {dimension_numbers = #tpu.dot_dimension_numbers<[1], [0], [0], [1], [0, 0, 1, 1], [], []>} : vector<8x8xbf16>, vector<8x4xbf16>, vector<8x4xf32> -> vector<8x4xf32>
    %24 = arith.truncf %23 : vector<8x4xf32> to vector<8x4xbf16>
    %c0_8 = arith.constant 0 : index
    %c0_9 = arith.constant 0 : index
    %25 = vector.load %arg6[%c0_8, %c0_9] : memref<8x32xbf16, #tpu.memory_space<vmem>>, vector<8x4xbf16>
    tpu.vector_store %arg6[%c0_8, %c0_9], %24 {strides = array<i32>} : memref<8x32xbf16, #tpu.memory_space<vmem>>, vector<8x4xbf16>,
    %26 = vector.extract_strided_slice %5 {offsets = [0, 4], sizes = [8, 4], strides = [1, 1]} : vector<8x32xbf16> to vector<8x4xbf16>
    %27 = vector.extract_strided_slice %6 {offsets = [0, 4], sizes = [8, 4], strides = [1, 1]} : vector<8x32xbf16> to vector<8x4xbf16>
    %28 = vector.extract_strided_slice %7 {offsets = [0, 4], sizes = [8, 4], strides = [1, 1]} : vector<8x32xbf16> to vector<8x4xbf16>
    %cst_10 = arith.constant dense<0.000000e+00> : vector<8x8xf32>
    %29 = tpu.matmul %26, %27, %cst_10 {dimension_numbers = #tpu.dot_dimension_numbers<[1], [1], [0], [0], [0, 0, 1, 0], [], []>} : vector<8x4xbf16>, vector<8x4xbf16>, vector<8x8xf32> -> vector<8x8xf32>
    %cst_11 = arith.constant dense<0xFF800000> : vector<8xf32>
    %30 = vector.multi_reduction <maximumf>, %29, %cst_11 [1] : vector<8x8xf32> to vector<8xf32>
    %31 = vector.shape_cast %30 : vector<8xf32> to vector<8x1xf32>
    %32 = vector.broadcast %31 : vector<8x1xf32> to vector<8x8xf32>
    %33 = arith.subf %29, %32 : vector<8x8xf32>
    %34 = math.exp %33 : vector<8x8xf32>
    %cst_12 = arith.constant dense<0.000000e+00> : vector<8xf32>
    %35 = vector.multi_reduction <add>, %34, %cst_12 [1] : vector<8x8xf32> to vector<8xf32>
    %36 = vector.shape_cast %35 : vector<8xf32> to vector<8x1xf32>
    %37 = tpu.reciprocal %36 {approx = true} : vector<8x1xf32> -> vector<8x1xf32>
    %38 = vector.broadcast %37 : vector<8x1xf32> to vector<8x8xf32>
    %39 = arith.mulf %34, %38 : vector<8x8xf32>
    %40 = arith.truncf %39 : vector<8x8xf32> to vector<8x8xbf16>
    %cst_13 = arith.constant dense<0.000000e+00> : vector<8x4xf32>
    %41 = tpu.matmul %40, %28, %cst_13 {dimension_numbers = #tpu.dot_dimension_numbers<[1], [0], [0], [1], [0, 0, 1, 1], [], []>} : vector<8x8xbf16>, vector<8x4xbf16>, vector<8x4xf32> -> vector<8x4xf32>
    %42 = arith.truncf %41 : vector<8x4xf32> to vector<8x4xbf16>
    %c0_14 = arith.constant 0 : index
    %c4 = arith.constant 4 : index
    %43 = vector.load %arg6[%c0_14, %c4] : memref<8x32xbf16, #tpu.memory_space<vmem>>, vector<8x4xbf16>
    tpu.vector_store %arg6[%c0_14, %c4], %42 {strides = array<i32>} : memref<8x32xbf16, #tpu.memory_space<vmem>>, vector<8x4xbf16>,
    %44 = vector.extract_strided_slice %5 {offsets = [0, 8], sizes = [8, 4], strides = [1, 1]} : vector<8x32xbf16> to vector<8x4xbf16>
    %45 = vector.extract_strided_slice %6 {offsets = [0, 8], sizes = [8, 4], strides = [1, 1]} : vector<8x32xbf16> to vector<8x4xbf16>
    %46 = vector.extract_strided_slice %7 {offsets = [0, 8], sizes = [8, 4], strides = [1, 1]} : vector<8x32xbf16> to vector<8x4xbf16>
    %cst_15 = arith.constant dense<0.000000e+00> : vector<8x8xf32>
    %47 = tpu.matmul %44, %45, %cst_15 {dimension_numbers = #tpu.dot_dimension_numbers<[1], [1], [0], [0], [0, 0, 1, 0], [], []>} : vector<8x4xbf16>, vector<8x4xbf16>, vector<8x8xf32> -> vector<8x8xf32>
    %cst_16 = arith.constant dense<0xFF800000> : vector<8xf32>
    %48 = vector.multi_reduction <maximumf>, %47, %cst_16 [1] : vector<8x8xf32> to vector<8xf32>
    %49 = vector.shape_cast %48 : vector<8xf32> to vector<8x1xf32>
    %50 = vector.broadcast %49 : vector<8x1xf32> to vector<8x8xf32>
    %51 = arith.subf %47, %50 : vector<8x8xf32>
    %52 = math.exp %51 : vector<8x8xf32>
    %cst_17 = arith.constant dense<0.000000e+00> : vector<8xf32>
    %53 = vector.multi_reduction <add>, %52, %cst_17 [1] : vector<8x8xf32> to vector<8xf32>
    %54 = vector.shape_cast %53 : vector<8xf32> to vector<8x1xf32>
    %55 = tpu.reciprocal %54 {approx = true} : vector<8x1xf32> -> vector<8x1xf32>
    %56 = vector.broadcast %55 : vector<8x1xf32> to vector<8x8xf32>
    %57 = arith.mulf %52, %56 : vector<8x8xf32>
    %58 = arith.truncf %57 : vector<8x8xf32> to vector<8x8xbf16>
    %cst_18 = arith.constant dense<0.000000e+00> : vector<8x4xf32>
    %59 = tpu.matmul %58, %46, %cst_18 {dimension_numbers = #tpu.dot_dimension_numbers<[1], [0], [0], [1], [0, 0, 1, 1], [], []>} : vector<8x8xbf16>, vector<8x4xbf16>, vector<8x4xf32> -> vector<8x4xf32>
    %60 = arith.truncf %59 : vector<8x4xf32> to vector<8x4xbf16>
    %c0_19 = arith.constant 0 : index
    %c8 = arith.constant 8 : index
    %61 = vector.load %arg6[%c0_19, %c8] : memref<8x32xbf16, #tpu.memory_space<vmem>>, vector<8x4xbf16>
    tpu.vector_store %arg6[%c0_19, %c8], %60 {strides = array<i32>} : memref<8x32xbf16, #tpu.memory_space<vmem>>, vector<8x4xbf16>,
    %62 = vector.extract_strided_slice %5 {offsets = [0, 12], sizes = [8, 4], strides = [1, 1]} : vector<8x32xbf16> to vector<8x4xbf16>
    %63 = vector.extract_strided_slice %6 {offsets = [0, 12], sizes = [8, 4], strides = [1, 1]} : vector<8x32xbf16> to vector<8x4xbf16>
    %64 = vector.extract_strided_slice %7 {offsets = [0, 12], sizes = [8, 4], strides = [1, 1]} : vector<8x32xbf16> to vector<8x4xbf16>
    %cst_20 = arith.constant dense<0.000000e+00> : vector<8x8xf32>
    %65 = tpu.matmul %62, %63, %cst_20 {dimension_numbers = #tpu.dot_dimension_numbers<[1], [1], [0], [0], [0, 0, 1, 0], [], []>} : vector<8x4xbf16>, vector<8x4xbf16>, vector<8x8xf32> -> vector<8x8xf32>
    %cst_21 = arith.constant dense<0xFF800000> : vector<8xf32>
    %66 = vector.multi_reduction <maximumf>, %65, %cst_21 [1] : vector<8x8xf32> to vector<8xf32>
    %67 = vector.shape_cast %66 : vector<8xf32> to vector<8x1xf32>
    %68 = vector.broadcast %67 : vector<8x1xf32> to vector<8x8xf32>
    %69 = arith.subf %65, %68 : vector<8x8xf32>
    %70 = math.exp %69 : vector<8x8xf32>
    %cst_22 = arith.constant dense<0.000000e+00> : vector<8xf32>
    %71 = vector.multi_reduction <add>, %70, %cst_22 [1] : vector<8x8xf32> to vector<8xf32>
    %72 = vector.shape_cast %71 : vector<8xf32> to vector<8x1xf32>
    %73 = tpu.reciprocal %72 {approx = true} : vector<8x1xf32> -> vector<8x1xf32>
    %74 = vector.broadcast %73 : vector<8x1xf32> to vector<8x8xf32>
    %75 = arith.mulf %70, %74 : vector<8x8xf32>
    %76 = arith.truncf %75 : vector<8x8xf32> to vector<8x8xbf16>
    %cst_23 = arith.constant dense<0.000000e+00> : vector<8x4xf32>
    %77 = tpu.matmul %76, %64, %cst_23 {dimension_numbers = #tpu.dot_dimension_numbers<[1], [0], [0], [1], [0, 0, 1, 1], [], []>} : vector<8x8xbf16>, vector<8x4xbf16>, vector<8x4xf32> -> vector<8x4xf32>
    %78 = arith.truncf %77 : vector<8x4xf32> to vector<8x4xbf16>
    %c0_24 = arith.constant 0 : index
    %c12 = arith.constant 12 : index
    %79 = vector.load %arg6[%c0_24, %c12] : memref<8x32xbf16, #tpu.memory_space<vmem>>, vector<8x4xbf16>
    tpu.vector_store %arg6[%c0_24, %c12], %78 {strides = array<i32>} : memref<8x32xbf16, #tpu.memory_space<vmem>>, vector<8x4xbf16>,
    %80 = vector.extract_strided_slice %5 {offsets = [0, 16], sizes = [8, 4], strides = [1, 1]} : vector<8x32xbf16> to vector<8x4xbf16>
    %81 = vector.extract_strided_slice %6 {offsets = [0, 16], sizes = [8, 4], strides = [1, 1]} : vector<8x32xbf16> to vector<8x4xbf16>
    %82 = vector.extract_strided_slice %7 {offsets = [0, 16], sizes = [8, 4], strides = [1, 1]} : vector<8x32xbf16> to vector<8x4xbf16>
    %cst_25 = arith.constant dense<0.000000e+00> : vector<8x8xf32>
    %83 = tpu.matmul %80, %81, %cst_25 {dimension_numbers = #tpu.dot_dimension_numbers<[1], [1], [0], [0], [0, 0, 1, 0], [], []>} : vector<8x4xbf16>, vector<8x4xbf16>, vector<8x8xf32> -> vector<8x8xf32>
    %cst_26 = arith.constant dense<0xFF800000> : vector<8xf32>
    %84 = vector.multi_reduction <maximumf>, %83, %cst_26 [1] : vector<8x8xf32> to vector<8xf32>
    %85 = vector.shape_cast %84 : vector<8xf32> to vector<8x1xf32>
    %86 = vector.broadcast %85 : vector<8x1xf32> to vector<8x8xf32>
    %87 = arith.subf %83, %86 : vector<8x8xf32>
    %88 = math.exp %87 : vector<8x8xf32>
    %cst_27 = arith.constant dense<0.000000e+00> : vector<8xf32>
    %89 = vector.multi_reduction <add>, %88, %cst_27 [1] : vector<8x8xf32> to vector<8xf32>
    %90 = vector.shape_cast %89 : vector<8xf32> to vector<8x1xf32>
    %91 = tpu.reciprocal %90 {approx = true} : vector<8x1xf32> -> vector<8x1xf32>
    %92 = vector.broadcast %91 : vector<8x1xf32> to vector<8x8xf32>
    %93 = arith.mulf %88, %92 : vector<8x8xf32>
    %94 = arith.truncf %93 : vector<8x8xf32> to vector<8x8xbf16>
    %cst_28 = arith.constant dense<0.000000e+00> : vector<8x4xf32>
    %95 = tpu.matmul %94, %82, %cst_28 {dimension_numbers = #tpu.dot_dimension_numbers<[1], [0], [0], [1], [0, 0, 1, 1], [], []>} : vector<8x8xbf16>, vector<8x4xbf16>, vector<8x4xf32> -> vector<8x4xf32>
    %96 = arith.truncf %95 : vector<8x4xf32> to vector<8x4xbf16>
    %c0_29 = arith.constant 0 : index
    %c16 = arith.constant 16 : index
    %97 = vector.load %arg6[%c0_29, %c16] : memref<8x32xbf16, #tpu.memory_space<vmem>>, vector<8x4xbf16>
    tpu.vector_store %arg6[%c0_29, %c16], %96 {strides = array<i32>} : memref<8x32xbf16, #tpu.memory_space<vmem>>, vector<8x4xbf16>,
    %98 = vector.extract_strided_slice %5 {offsets = [0, 20], sizes = [8, 4], strides = [1, 1]} : vector<8x32xbf16> to vector<8x4xbf16>
    %99 = vector.extract_strided_slice %6 {offsets = [0, 20], sizes = [8, 4], strides = [1, 1]} : vector<8x32xbf16> to vector<8x4xbf16>
    %100 = vector.extract_strided_slice %7 {offsets = [0, 20], sizes = [8, 4], strides = [1, 1]} : vector<8x32xbf16> to vector<8x4xbf16>
    %cst_30 = arith.constant dense<0.000000e+00> : vector<8x8xf32>
    %101 = tpu.matmul %98, %99, %cst_30 {dimension_numbers = #tpu.dot_dimension_numbers<[1], [1], [0], [0], [0, 0, 1, 0], [], []>} : vector<8x4xbf16>, vector<8x4xbf16>, vector<8x8xf32> -> vector<8x8xf32>
    %cst_31 = arith.constant dense<0xFF800000> : vector<8xf32>
    %102 = vector.multi_reduction <maximumf>, %101, %cst_31 [1] : vector<8x8xf32> to vector<8xf32>
    %103 = vector.shape_cast %102 : vector<8xf32> to vector<8x1xf32>
    %104 = vector.broadcast %103 : vector<8x1xf32> to vector<8x8xf32>
    %105 = arith.subf %101, %104 : vector<8x8xf32>
    %106 = math.exp %105 : vector<8x8xf32>
    %cst_32 = arith.constant dense<0.000000e+00> : vector<8xf32>
    %107 = vector.multi_reduction <add>, %106, %cst_32 [1] : vector<8x8xf32> to vector<8xf32>
    %108 = vector.shape_cast %107 : vector<8xf32> to vector<8x1xf32>
    %109 = tpu.reciprocal %108 {approx = true} : vector<8x1xf32> -> vector<8x1xf32>
    %110 = vector.broadcast %109 : vector<8x1xf32> to vector<8x8xf32>
    %111 = arith.mulf %106, %110 : vector<8x8xf32>
    %112 = arith.truncf %111 : vector<8x8xf32> to vector<8x8xbf16>
    %cst_33 = arith.constant dense<0.000000e+00> : vector<8x4xf32>
    %113 = tpu.matmul %112, %100, %cst_33 {dimension_numbers = #tpu.dot_dimension_numbers<[1], [0], [0], [1], [0, 0, 1, 1], [], []>} : vector<8x8xbf16>, vector<8x4xbf16>, vector<8x4xf32> -> vector<8x4xf32>
    %114 = arith.truncf %113 : vector<8x4xf32> to vector<8x4xbf16>
    %c0_34 = arith.constant 0 : index
    %c20 = arith.constant 20 : index
    %115 = vector.load %arg6[%c0_34, %c20] : memref<8x32xbf16, #tpu.memory_space<vmem>>, vector<8x4xbf16>
    tpu.vector_store %arg6[%c0_34, %c20], %114 {strides = array<i32>} : memref<8x32xbf16, #tpu.memory_space<vmem>>, vector<8x4xbf16>,
    %116 = vector.extract_strided_slice %5 {offsets = [0, 24], sizes = [8, 4], strides = [1, 1]} : vector<8x32xbf16> to vector<8x4xbf16>
    %117 = vector.extract_strided_slice %6 {offsets = [0, 24], sizes = [8, 4], strides = [1, 1]} : vector<8x32xbf16> to vector<8x4xbf16>
    %118 = vector.extract_strided_slice %7 {offsets = [0, 24], sizes = [8, 4], strides = [1, 1]} : vector<8x32xbf16> to vector<8x4xbf16>
    %cst_35 = arith.constant dense<0.000000e+00> : vector<8x8xf32>
    %119 = tpu.matmul %116, %117, %cst_35 {dimension_numbers = #tpu.dot_dimension_numbers<[1], [1], [0], [0], [0, 0, 1, 0], [], []>} : vector<8x4xbf16>, vector<8x4xbf16>, vector<8x8xf32> -> vector<8x8xf32>
    %cst_36 = arith.constant dense<0xFF800000> : vector<8xf32>
    %120 = vector.multi_reduction <maximumf>, %119, %cst_36 [1] : vector<8x8xf32> to vector<8xf32>
    %121 = vector.shape_cast %120 : vector<8xf32> to vector<8x1xf32>
    %122 = vector.broadcast %121 : vector<8x1xf32> to vector<8x8xf32>
    %123 = arith.subf %119, %122 : vector<8x8xf32>
    %124 = math.exp %123 : vector<8x8xf32>
    %cst_37 = arith.constant dense<0.000000e+00> : vector<8xf32>
    %125 = vector.multi_reduction <add>, %124, %cst_37 [1] : vector<8x8xf32> to vector<8xf32>
    %126 = vector.shape_cast %125 : vector<8xf32> to vector<8x1xf32>
    %127 = tpu.reciprocal %126 {approx = true} : vector<8x1xf32> -> vector<8x1xf32>
    %128 = vector.broadcast %127 : vector<8x1xf32> to vector<8x8xf32>
    %129 = arith.mulf %124, %128 : vector<8x8xf32>
    %130 = arith.truncf %129 : vector<8x8xf32> to vector<8x8xbf16>
    %cst_38 = arith.constant dense<0.000000e+00> : vector<8x4xf32>
    %131 = tpu.matmul %130, %118, %cst_38 {dimension_numbers = #tpu.dot_dimension_numbers<[1], [0], [0], [1], [0, 0, 1, 1], [], []>} : vector<8x8xbf16>, vector<8x4xbf16>, vector<8x4xf32> -> vector<8x4xf32>
    %132 = arith.truncf %131 : vector<8x4xf32> to vector<8x4xbf16>
    %c0_39 = arith.constant 0 : index
    %c24 = arith.constant 24 : index
    %133 = vector.load %arg6[%c0_39, %c24] : memref<8x32xbf16, #tpu.memory_space<vmem>>, vector<8x4xbf16>
    tpu.vector_store %arg6[%c0_39, %c24], %132 {strides = array<i32>} : memref<8x32xbf16, #tpu.memory_space<vmem>>, vector<8x4xbf16>,
    %134 = vector.extract_strided_slice %5 {offsets = [0, 28], sizes = [8, 4], strides = [1, 1]} : vector<8x32xbf16> to vector<8x4xbf16>
    %135 = vector.extract_strided_slice %6 {offsets = [0, 28], sizes = [8, 4], strides = [1, 1]} : vector<8x32xbf16> to vector<8x4xbf16>
    %136 = vector.extract_strided_slice %7 {offsets = [0, 28], sizes = [8, 4], strides = [1, 1]} : vector<8x32xbf16> to vector<8x4xbf16>
    %cst_40 = arith.constant dense<0.000000e+00> : vector<8x8xf32>
    %137 = tpu.matmul %134, %135, %cst_40 {dimension_numbers = #tpu.dot_dimension_numbers<[1], [1], [0], [0], [0, 0, 1, 0], [], []>} : vector<8x4xbf16>, vector<8x4xbf16>, vector<8x8xf32> -> vector<8x8xf32>
    %cst_41 = arith.constant dense<0xFF800000> : vector<8xf32>
    %138 = vector.multi_reduction <maximumf>, %137, %cst_41 [1] : vector<8x8xf32> to vector<8xf32>
    %139 = vector.shape_cast %138 : vector<8xf32> to vector<8x1xf32>
    %140 = vector.broadcast %139 : vector<8x1xf32> to vector<8x8xf32>
    %141 = arith.subf %137, %140 : vector<8x8xf32>
    %142 = math.exp %141 : vector<8x8xf32>
    %cst_42 = arith.constant dense<0.000000e+00> : vector<8xf32>
    %143 = vector.multi_reduction <add>, %142, %cst_42 [1] : vector<8x8xf32> to vector<8xf32>
    %144 = vector.shape_cast %143 : vector<8xf32> to vector<8x1xf32>
    %145 = tpu.reciprocal %144 {approx = true} : vector<8x1xf32> -> vector<8x1xf32>
    %146 = vector.broadcast %145 : vector<8x1xf32> to vector<8x8xf32>
    %147 = arith.mulf %142, %146 : vector<8x8xf32>
    %148 = arith.truncf %147 : vector<8x8xf32> to vector<8x8xbf16>
    %cst_43 = arith.constant dense<0.000000e+00> : vector<8x4xf32>
    %149 = tpu.matmul %148, %136, %cst_43 {dimension_numbers = #tpu.dot_dimension_numbers<[1], [0], [0], [1], [0, 0, 1, 1], [], []>} : vector<8x8xbf16>, vector<8x4xbf16>, vector<8x4xf32> -> vector<8x4xf32>
    %150 = arith.truncf %149 : vector<8x4xf32> to vector<8x4xbf16>
    %c0_44 = arith.constant 0 : index
    %c28 = arith.constant 28 : index
    %151 = vector.load %arg6[%c0_44, %c28] : memref<8x32xbf16, #tpu.memory_space<vmem>>, vector<8x4xbf16>
    tpu.vector_store %arg6[%c0_44, %c28], %150 {strides = array<i32>} : memref<8x32xbf16, #tpu.memory_space<vmem>>, vector<8x4xbf16>,
    %c0_45 = arith.constant 0 : index
    %c0_46 = arith.constant 0 : index
    %152 = vector.load %arg6[%c0_45, %c0_46] : memref<8x32xbf16, #tpu.memory_space<vmem>>, vector<8x32xbf16>
    %c0_47 = arith.constant 0 : index
    %c0_48 = arith.constant 0 : index
    %153 = vector.load %arg3[%c0_47, %c0_48] : memref<32x32xbf16, #tpu.memory_space<vmem>>, vector<32x32xbf16>
    %cst_49 = arith.constant dense<0.000000e+00> : vector<8x32xf32>
    %154 = tpu.matmul %152, %153, %cst_49 {dimension_numbers = #tpu.dot_dimension_numbers<[1], [0], [0], [1], [0, 0, 1, 1], [], []>} : vector<8x32xbf16>, vector<32x32xbf16>, vector<8x32xf32> -> vector<8x32xf32>
    %c0_50 = arith.constant 0 : index
    %c0_51 = arith.constant 0 : index
    %155 = vector.load %arg4[%c0_50, %c0_51] : memref<1x32xf32, #tpu.memory_space<vmem>>, vector<1x32xf32>
    %156 = vector.broadcast %155 : vector<1x32xf32> to vector<8x32xf32>
    %157 = arith.addf %154, %156 : vector<8x32xf32>
    %158 = vector.shape_cast %157 : vector<8x32xf32> to vector<1x8x32xf32>
    %c0_52 = arith.constant 0 : index
    %c0_53 = arith.constant 0 : index
    %c0_54 = arith.constant 0 : index
    %159 = vector.load %arg5[%c0_52, %c0_53, %c0_54] : memref<1x8x32xf32, #tpu.memory_space<vmem>>, vector<1x8x32xf32>
    tpu.vector_store %arg5[%c0_52, %c0_53, %c0_54], %158 {strides = array<i32>} : memref<1x8x32xf32, #tpu.memory_space<vmem>>, vector<1x8x32xf32>,
    return
  }
  func.func @transform_0(%arg0: i32) -> (i32, i32, i32) {
    %c0_i32 = arith.constant 0 : i32
    %c0_i32_0 = arith.constant 0 : i32
    %c0_i32_1 = arith.constant 0 : i32
    return %arg0, %c0_i32, %c0_i32_0 : i32, i32, i32
  }
  func.func @transform_1(%arg0: i32) -> (i32, i32) {
    %c0_i32 = arith.constant 0 : i32
    %c0_i32_0 = arith.constant 0 : i32
    %c0_i32_1 = arith.constant 0 : i32
    return %c0_i32, %c0_i32_0 : i32, i32
  }
  func.func @transform_2(%arg0: i32) -> (i32, i32) {
    %c0_i32 = arith.constant 0 : i32
    %c0_i32_0 = arith.constant 0 : i32
    %c0_i32_1 = arith.constant 0 : i32
    return %c0_i32, %c0_i32_0 : i32, i32
  }
  func.func @transform_3(%arg0: i32) -> (i32, i32) {
    %c0_i32 = arith.constant 0 : i32
    %c0_i32_0 = arith.constant 0 : i32
    %c0_i32_1 = arith.constant 0 : i32
    return %c0_i32, %c0_i32_0 : i32, i32
  }
  func.func @transform_4(%arg0: i32) -> (i32, i32, i32) {
    %c0_i32 = arith.constant 0 : i32
    %c0_i32_0 = arith.constant 0 : i32
    %c0_i32_1 = arith.constant 0 : i32
    return %arg0, %c0_i32, %c0_i32_0 : i32, i32, i32
  }
}

module attributes {stable_mosaic.version = 11 : i64} {
  func.func @kernel(%arg0: i32, %arg1: memref<1x8x32xbf16, #tpu.memory_space<vmem>>, %arg2: memref<32x96xbf16, #tpu.memory_space<vmem>>, %arg3: memref<32x32xbf16, #tpu.memory_space<vmem>>, %arg4: memref<1x32xf32, #tpu.memory_space<vmem>>, %arg5: memref<1x8x32xf32, #tpu.memory_space<vmem>>, %arg6: memref<8x32xbf16, #tpu.memory_space<vmem>>) attributes {dimension_semantics = [#tpu.dimension_semantics<parallel>], iteration_bounds = array<i64: 2>, scalar_prefetch = 0 : i64, scratch_operands = 1 : i64, tpu.core_type = #tpu.core_type<tc>, window_params = [{transform_indices = @transform_0, window_bounds = array<i64: 1, 8, 32>}, {pipeline_mode = #tpu.pipeline_mode<synchronous>, transform_indices = @transform_1, window_bounds = array<i64: 32, 96>}, {pipeline_mode = #tpu.pipeline_mode<synchronous>, transform_indices = @transform_2, window_bounds = array<i64: 32, 32>}, {pipeline_mode = #tpu.pipeline_mode<synchronous>, transform_indices = @transform_3, window_bounds = array<i64: 1, 32>}, {transform_indices = @transform_4, window_bounds = array<i64: 1, 8, 32>}]} {
    %c0 = arith.constant 0 : index
    %c0_0 = arith.constant 0 : index
    %c0_1 = arith.constant 0 : index
    %0 = vector.load %arg1[%c0, %c0_0, %c0_1] : memref<1x8x32xbf16, #tpu.memory_space<vmem>>, vector<1x8x32xbf16>
    %1 = vector.shape_cast %0 : vector<1x8x32xbf16> to vector<8x32xbf16>
    %c0_2 = arith.constant 0 : index
    %c0_3 = arith.constant 0 : index
    %2 = vector.load %arg2[%c0_2, %c0_3] : memref<32x96xbf16, #tpu.memory_space<vmem>>, vector<32x96xbf16>
    %cst = arith.constant dense<0.000000e+00> : vector<8x96xf32>
    %3 = tpu.matmul %1, %2, %cst {dimension_numbers = #tpu.dot_dimension_numbers<[1], [0], [0], [1], [0, 0, 1, 1], [], []>} : vector<8x32xbf16>, vector<32x96xbf16>, vector<8x96xf32> -> vector<8x96xf32>
    %4 = arith.truncf %3 : vector<8x96xf32> to vector<8x96xbf16>
    %5 = vector.extract_strided_slice %4 {offsets = [0, 0], sizes = [8, 32], strides = [1, 1]} : vector<8x96xbf16> to vector<8x32xbf16>
    %6 = vector.extract_strided_slice %4 {offsets = [0, 32], sizes = [8, 32], strides = [1, 1]} : vector<8x96xbf16> to vector<8x32xbf16>
    %7 = vector.extract_strided_slice %4 {offsets = [0, 64], sizes = [8, 32], strides = [1, 1]} : vector<8x96xbf16> to vector<8x32xbf16>
    %8 = vector.extract_strided_slice %5 {offsets = [0, 0], sizes = [8, 4], strides = [1, 1]} : vector<8x32xbf16> to vector<8x4xbf16>
    %9 = vector.extract_strided_slice %6 {offsets = [0, 0], sizes = [8, 4], strides = [1, 1]} : vector<8x32xbf16> to vector<8x4xbf16>
    %10 = vector.extract_strided_slice %7 {offsets = [0, 0], sizes = [8, 4], strides = [1, 1]} : vector<8x32xbf16> to vector<8x4xbf16>
    %cst_4 = arith.constant dense<0.000000e+00> : vector<8x8xf32>
    %11 = tpu.matmul %8, %9, %cst_4 {dimension_numbers = #tpu.dot_dimension_numbers<[1], [1], [0], [0], [0, 0, 1, 0], [], []>} : vector<8x4xbf16>, vector<8x4xbf16>, vector<8x8xf32> -> vector<8x8xf32>
    %cst_5 = arith.constant dense<0xFF800000> : vector<8xf32>
    %12 = vector.multi_reduction <maximumf>, %11, %cst_5 [1] : vector<8x8xf32> to vector<8xf32>
    %13 = vector.shape_cast %12 : vector<8xf32> to vector<8x1xf32>
    %14 = vector.broadcast %13 : vector<8x1xf32> to vector<8x8xf32>
    %15 = arith.subf %11, %14 : vector<8x8xf32>
    %16 = math.exp %15 : vector<8x8xf32>
    %cst_6 = arith.constant dense<0.000000e+00> : vector<8xf32>
    %17 = vector.multi_reduction <add>, %16, %cst_6 [1] : vector<8x8xf32> to vector<8xf32>
    %18 = vector.shape_cast %17 : vector<8xf32> to vector<8x1xf32>
    %19 = tpu.reciprocal %18 {approx = true} : vector<8x1xf32> -> vector<8x1xf32>
    %20 = vector.broadcast %19 : vector<8x1xf32> to vector<8x8xf32>
    %21 = arith.mulf %16, %20 : vector<8x8xf32>
    %22 = arith.truncf %21 : vector<8x8xf32> to vector<8x8xbf16>
    %cst_7 = arith.constant dense<0.000000e+00> : vector<8x4xf32>
    %23 = tpu.matmul %22, %10, %cst_7 {dimension_numbers = #tpu.dot_dimension_numbers<[1], [0], [0], [1], [0, 0, 1, 1], [], []>} : vector<8x8xbf16>, vector<8x4xbf16>, vector<8x4xf32> -> vector<8x4xf32>
    %24 = arith.truncf %23 : vector<8x4xf32> to vector<8x4xbf16>
    %c0_8 = arith.constant 0 : index
    %c0_9 = arith.constant 0 : index
    %25 = vector.load %arg6[%c0_8, %c0_9] : memref<8x32xbf16, #tpu.memory_space<vmem>>, vector<8x4xbf16>
    tpu.vector_store %arg6[%c0_8, %c0_9], %24 {strides = array<i32>} : memref<8x32xbf16, #tpu.memory_space<vmem>>, vector<8x4xbf16>,
    %26 = vector.extract_strided_slice %5 {offsets = [0, 4], sizes = [8, 4], strides = [1, 1]} : vector<8x32xbf16> to vector<8x4xbf16>
    %27 = vector.extract_strided_slice %6 {offsets = [0, 4], sizes = [8, 4], strides = [1, 1]} : vector<8x32xbf16> to vector<8x4xbf16>
    %28 = vector.extract_strided_slice %7 {offsets = [0, 4], sizes = [8, 4], strides = [1, 1]} : vector<8x32xbf16> to vector<8x4xbf16>
    %cst_10 = arith.constant dense<0.000000e+00> : vector<8x8xf32>
    %29 = tpu.matmul %26, %27, %cst_10 {dimension_numbers = #tpu.dot_dimension_numbers<[1], [1], [0], [0], [0, 0, 1, 0], [], []>} : vector<8x4xbf16>, vector<8x4xbf16>, vector<8x8xf32> -> vector<8x8xf32>
    %cst_11 = arith.constant dense<0xFF800000> : vector<8xf32>
    %30 = vector.multi_reduction <maximumf>, %29, %cst_11 [1] : vector<8x8xf32> to vector<8xf32>
    %31 = vector.shape_cast %30 : vector<8xf32> to vector<8x1xf32>
    %32 = vector.broadcast %31 : vector<8x1xf32> to vector<8x8xf32>
    %33 = arith.subf %29, %32 : vector<8x8xf32>
    %34 = math.exp %33 : vector<8x8xf32>
    %cst_12 = arith.constant dense<0.000000e+00> : vector<8xf32>
    %35 = vector.multi_reduction <add>, %34, %cst_12 [1] : vector<8x8xf32> to vector<8xf32>
    %36 = vector.shape_cast %35 : vector<8xf32> to vector<8x1xf32>
    %37 = tpu.reciprocal %36 {approx = true} : vector<8x1xf32> -> vector<8x1xf32>
    %38 = vector.broadcast %37 : vector<8x1xf32> to vector<8x8xf32>
    %39 = arith.mulf %34, %38 : vector<8x8xf32>
    %40 = arith.truncf %39 : vector<8x8xf32> to vector<8x8xbf16>
    %cst_13 = arith.constant dense<0.000000e+00> : vector<8x4xf32>
    %41 = tpu.matmul %40, %28, %cst_13 {dimension_numbers = #tpu.dot_dimension_numbers<[1], [0], [0], [1], [0, 0, 1, 1], [], []>} : vector<8x8xbf16>, vector<8x4xbf16>, vector<8x4xf32> -> vector<8x4xf32>
    %42 = arith.truncf %41 : vector<8x4xf32> to vector<8x4xbf16>
    %c0_14 = arith.constant 0 : index
    %c4 = arith.constant 4 : index
    %43 = vector.load %arg6[%c0_14, %c4] : memref<8x32xbf16, #tpu.memory_space<vmem>>, vector<8x4xbf16>
    tpu.vector_store %arg6[%c0_14, %c4], %42 {strides = array<i32>} : memref<8x32xbf16, #tpu.memory_space<vmem>>, vector<8x4xbf16>,
    %44 = vector.extract_strided_slice %5 {offsets = [0, 8], sizes = [8, 4], strides = [1, 1]} : vector<8x32xbf16> to vector<8x4xbf16>
    %45 = vector.extract_strided_slice %6 {offsets = [0, 8], sizes = [8, 4], strides = [1, 1]} : vector<8x32xbf16> to vector<8x4xbf16>
    %46 = vector.extract_strided_slice %7 {offsets = [0, 8], sizes = [8, 4], strides = [1, 1]} : vector<8x32xbf16> to vector<8x4xbf16>
    %cst_15 = arith.constant dense<0.000000e+00> : vector<8x8xf32>
    %47 = tpu.matmul %44, %45, %cst_15 {dimension_numbers = #tpu.dot_dimension_numbers<[1], [1], [0], [0], [0, 0, 1, 0], [], []>} : vector<8x4xbf16>, vector<8x4xbf16>, vector<8x8xf32> -> vector<8x8xf32>
    %cst_16 = arith.constant dense<0xFF800000> : vector<8xf32>
    %48 = vector.multi_reduction <maximumf>, %47, %cst_16 [1] : vector<8x8xf32> to vector<8xf32>
    %49 = vector.shape_cast %48 : vector<8xf32> to vector<8x1xf32>
    %50 = vector.broadcast %49 : vector<8x1xf32> to vector<8x8xf32>
    %51 = arith.subf %47, %50 : vector<8x8xf32>
    %52 = math.exp %51 : vector<8x8xf32>
    %cst_17 = arith.constant dense<0.000000e+00> : vector<8xf32>
    %53 = vector.multi_reduction <add>, %52, %cst_17 [1] : vector<8x8xf32> to vector<8xf32>
    %54 = vector.shape_cast %53 : vector<8xf32> to vector<8x1xf32>
    %55 = tpu.reciprocal %54 {approx = true} : vector<8x1xf32> -> vector<8x1xf32>
    %56 = vector.broadcast %55 : vector<8x1xf32> to vector<8x8xf32>
    %57 = arith.mulf %52, %56 : vector<8x8xf32>
    %58 = arith.truncf %57 : vector<8x8xf32> to vector<8x8xbf16>
    %cst_18 = arith.constant dense<0.000000e+00> : vector<8x4xf32>
    %59 = tpu.matmul %58, %46, %cst_18 {dimension_numbers = #tpu.dot_dimension_numbers<[1], [0], [0], [1], [0, 0, 1, 1], [], []>} : vector<8x8xbf16>, vector<8x4xbf16>, vector<8x4xf32> -> vector<8x4xf32>
    %60 = arith.truncf %59 : vector<8x4xf32> to vector<8x4xbf16>
    %c0_19 = arith.constant 0 : index
    %c8 = arith.constant 8 : index
    %61 = vector.load %arg6[%c0_19, %c8] : memref<8x32xbf16, #tpu.memory_space<vmem>>, vector<8x4xbf16>
    tpu.vector_store %arg6[%c0_19, %c8], %60 {strides = array<i32>} : memref<8x32xbf16, #tpu.memory_space<vmem>>, vector<8x4xbf16>,
    %62 = vector.extract_strided_slice %5 {offsets = [0, 12], sizes = [8, 4], strides = [1, 1]} : vector<8x32xbf16> to vector<8x4xbf16>
    %63 = vector.extract_strided_slice %6 {offsets = [0, 12], sizes = [8, 4], strides = [1, 1]} : vector<8x32xbf16> to vector<8x4xbf16>
    %64 = vector.extract_strided_slice %7 {offsets = [0, 12], sizes = [8, 4], strides = [1, 1]} : vector<8x32xbf16> to vector<8x4xbf16>
    %cst_20 = arith.constant dense<0.000000e+00> : vector<8x8xf32>
    %65 = tpu.matmul %62, %63, %cst_20 {dimension_numbers = #tpu.dot_dimension_numbers<[1], [1], [0], [0], [0, 0, 1, 0], [], []>} : vector<8x4xbf16>, vector<8x4xbf16>, vector<8x8xf32> -> vector<8x8xf32>
    %cst_21 = arith.constant dense<0xFF800000> : vector<8xf32>
    %66 = vector.multi_reduction <maximumf>, %65, %cst_21 [1] : vector<8x8xf32> to vector<8xf32>
    %67 = vector.shape_cast %66 : vector<8xf32> to vector<8x1xf32>
    %68 = vector.broadcast %67 : vector<8x1xf32> to vector<8x8xf32>
    %69 = arith.subf %65, %68 : vector<8x8xf32>
    %70 = math.exp %69 : vector<8x8xf32>
    %cst_22 = arith.constant dense<0.000000e+00> : vector<8xf32>
    %71 = vector.multi_reduction <add>, %70, %cst_22 [1] : vector<8x8xf32> to vector<8xf32>
    %72 = vector.shape_cast %71 : vector<8xf32> to vector<8x1xf32>
    %73 = tpu.reciprocal %72 {approx = true} : vector<8x1xf32> -> vector<8x1xf32>
    %74 = vector.broadcast %73 : vector<8x1xf32> to vector<8x8xf32>
    %75 = arith.mulf %70, %74 : vector<8x8xf32>
    %76 = arith.truncf %75 : vector<8x8xf32> to vector<8x8xbf16>
    %cst_23 = arith.constant dense<0.000000e+00> : vector<8x4xf32>
    %77 = tpu.matmul %76, %64, %cst_23 {dimension_numbers = #tpu.dot_dimension_numbers<[1], [0], [0], [1], [0, 0, 1, 1], [], []>} : vector<8x8xbf16>, vector<8x4xbf16>, vector<8x4xf32> -> vector<8x4xf32>
    %78 = arith.truncf %77 : vector<8x4xf32> to vector<8x4xbf16>
    %c0_24 = arith.constant 0 : index
    %c12 = arith.constant 12 : index
    %79 = vector.load %arg6[%c0_24, %c12] : memref<8x32xbf16, #tpu.memory_space<vmem>>, vector<8x4xbf16>
    tpu.vector_store %arg6[%c0_24, %c12], %78 {strides = array<i32>} : memref<8x32xbf16, #tpu.memory_space<vmem>>, vector<8x4xbf16>,
    %80 = vector.extract_strided_slice %5 {offsets = [0, 16], sizes = [8, 4], strides = [1, 1]} : vector<8x32xbf16> to vector<8x4xbf16>
    %81 = vector.extract_strided_slice %6 {offsets = [0, 16], sizes = [8, 4], strides = [1, 1]} : vector<8x32xbf16> to vector<8x4xbf16>
    %82 = vector.extract_strided_slice %7 {offsets = [0, 16], sizes = [8, 4], strides = [1, 1]} : vector<8x32xbf16> to vector<8x4xbf16>
    %cst_25 = arith.constant dense<0.000000e+00> : vector<8x8xf32>
    %83 = tpu.matmul %80, %81, %cst_25 {dimension_numbers = #tpu.dot_dimension_numbers<[1], [1], [0], [0], [0, 0, 1, 0], [], []>} : vector<8x4xbf16>, vector<8x4xbf16>, vector<8x8xf32> -> vector<8x8xf32>
    %cst_26 = arith.constant dense<0xFF800000> : vector<8xf32>
    %84 = vector.multi_reduction <maximumf>, %83, %cst_26 [1] : vector<8x8xf32> to vector<8xf32>
    %85 = vector.shape_cast %84 : vector<8xf32> to vector<8x1xf32>
    %86 = vector.broadcast %85 : vector<8x1xf32> to vector<8x8xf32>
    %87 = arith.subf %83, %86 : vector<8x8xf32>
    %88 = math.exp %87 : vector<8x8xf32>
    %cst_27 = arith.constant dense<0.000000e+00> : vector<8xf32>
    %89 = vector.multi_reduction <add>, %88, %cst_27 [1] : vector<8x8xf32> to vector<8xf32>
    %90 = vector.shape_cast %89 : vector<8xf32> to vector<8x1xf32>
    %91 = tpu.reciprocal %90 {approx = true} : vector<8x1xf32> -> vector<8x1xf32>
    %92 = vector.broadcast %91 : vector<8x1xf32> to vector<8x8xf32>
    %93 = arith.mulf %88, %92 : vector<8x8xf32>
    %94 = arith.truncf %93 : vector<8x8xf32> to vector<8x8xbf16>
    %cst_28 = arith.constant dense<0.000000e+00> : vector<8x4xf32>
    %95 = tpu.matmul %94, %82, %cst_28 {dimension_numbers = #tpu.dot_dimension_numbers<[1], [0], [0], [1], [0, 0, 1, 1], [], []>} : vector<8x8xbf16>, vector<8x4xbf16>, vector<8x4xf32> -> vector<8x4xf32>
    %96 = arith.truncf %95 : vector<8x4xf32> to vector<8x4xbf16>
    %c0_29 = arith.constant 0 : index
    %c16 = arith.constant 16 : index
    %97 = vector.load %arg6[%c0_29, %c16] : memref<8x32xbf16, #tpu.memory_space<vmem>>, vector<8x4xbf16>
    tpu.vector_store %arg6[%c0_29, %c16], %96 {strides = array<i32>} : memref<8x32xbf16, #tpu.memory_space<vmem>>, vector<8x4xbf16>,
    %98 = vector.extract_strided_slice %5 {offsets = [0, 20], sizes = [8, 4], strides = [1, 1]} : vector<8x32xbf16> to vector<8x4xbf16>
    %99 = vector.extract_strided_slice %6 {offsets = [0, 20], sizes = [8, 4], strides = [1, 1]} : vector<8x32xbf16> to vector<8x4xbf16>
    %100 = vector.extract_strided_slice %7 {offsets = [0, 20], sizes = [8, 4], strides = [1, 1]} : vector<8x32xbf16> to vector<8x4xbf16>
    %cst_30 = arith.constant dense<0.000000e+00> : vector<8x8xf32>
    %101 = tpu.matmul %98, %99, %cst_30 {dimension_numbers = #tpu.dot_dimension_numbers<[1], [1], [0], [0], [0, 0, 1, 0], [], []>} : vector<8x4xbf16>, vector<8x4xbf16>, vector<8x8xf32> -> vector<8x8xf32>
    %cst_31 = arith.constant dense<0xFF800000> : vector<8xf32>
    %102 = vector.multi_reduction <maximumf>, %101, %cst_31 [1] : vector<8x8xf32> to vector<8xf32>
    %103 = vector.shape_cast %102 : vector<8xf32> to vector<8x1xf32>
    %104 = vector.broadcast %103 : vector<8x1xf32> to vector<8x8xf32>
    %105 = arith.subf %101, %104 : vector<8x8xf32>
    %106 = math.exp %105 : vector<8x8xf32>
    %cst_32 = arith.constant dense<0.000000e+00> : vector<8xf32>
    %107 = vector.multi_reduction <add>, %106, %cst_32 [1] : vector<8x8xf32> to vector<8xf32>
    %108 = vector.shape_cast %107 : vector<8xf32> to vector<8x1xf32>
    %109 = tpu.reciprocal %108 {approx = true} : vector<8x1xf32> -> vector<8x1xf32>
    %110 = vector.broadcast %109 : vector<8x1xf32> to vector<8x8xf32>
    %111 = arith.mulf %106, %110 : vector<8x8xf32>
    %112 = arith.truncf %111 : vector<8x8xf32> to vector<8x8xbf16>
    %cst_33 = arith.constant dense<0.000000e+00> : vector<8x4xf32>
    %113 = tpu.matmul %112, %100, %cst_33 {dimension_numbers = #tpu.dot_dimension_numbers<[1], [0], [0], [1], [0, 0, 1, 1], [], []>} : vector<8x8xbf16>, vector<8x4xbf16>, vector<8x4xf32> -> vector<8x4xf32>
    %114 = arith.truncf %113 : vector<8x4xf32> to vector<8x4xbf16>
    %c0_34 = arith.constant 0 : index
    %c20 = arith.constant 20 : index
    %115 = vector.load %arg6[%c0_34, %c20] : memref<8x32xbf16, #tpu.memory_space<vmem>>, vector<8x4xbf16>
    tpu.vector_store %arg6[%c0_34, %c20], %114 {strides = array<i32>} : memref<8x32xbf16, #tpu.memory_space<vmem>>, vector<8x4xbf16>,
    %116 = vector.extract_strided_slice %5 {offsets = [0, 24], sizes = [8, 4], strides = [1, 1]} : vector<8x32xbf16> to vector<8x4xbf16>
    %117 = vector.extract_strided_slice %6 {offsets = [0, 24], sizes = [8, 4], strides = [1, 1]} : vector<8x32xbf16> to vector<8x4xbf16>
    %118 = vector.extract_strided_slice %7 {offsets = [0, 24], sizes = [8, 4], strides = [1, 1]} : vector<8x32xbf16> to vector<8x4xbf16>
    %cst_35 = arith.constant dense<0.000000e+00> : vector<8x8xf32>
    %119 = tpu.matmul %116, %117, %cst_35 {dimension_numbers = #tpu.dot_dimension_numbers<[1], [1], [0], [0], [0, 0, 1, 0], [], []>} : vector<8x4xbf16>, vector<8x4xbf16>, vector<8x8xf32> -> vector<8x8xf32>
    %cst_36 = arith.constant dense<0xFF800000> : vector<8xf32>
    %120 = vector.multi_reduction <maximumf>, %119, %cst_36 [1] : vector<8x8xf32> to vector<8xf32>
    %121 = vector.shape_cast %120 : vector<8xf32> to vector<8x1xf32>
    %122 = vector.broadcast %121 : vector<8x1xf32> to vector<8x8xf32>
    %123 = arith.subf %119, %122 : vector<8x8xf32>
    %124 = math.exp %123 : vector<8x8xf32>
    %cst_37 = arith.constant dense<0.000000e+00> : vector<8xf32>
    %125 = vector.multi_reduction <add>, %124, %cst_37 [1] : vector<8x8xf32> to vector<8xf32>
    %126 = vector.shape_cast %125 : vector<8xf32> to vector<8x1xf32>
    %127 = tpu.reciprocal %126 {approx = true} : vector<8x1xf32> -> vector<8x1xf32>
    %128 = vector.broadcast %127 : vector<8x1xf32> to vector<8x8xf32>
    %129 = arith.mulf %124, %128 : vector<8x8xf32>
    %130 = arith.truncf %129 : vector<8x8xf32> to vector<8x8xbf16>
    %cst_38 = arith.constant dense<0.000000e+00> : vector<8x4xf32>
    %131 = tpu.matmul %130, %118, %cst_38 {dimension_numbers = #tpu.dot_dimension_numbers<[1], [0], [0], [1], [0, 0, 1, 1], [], []>} : vector<8x8xbf16>, vector<8x4xbf16>, vector<8x4xf32> -> vector<8x4xf32>
    %132 = arith.truncf %131 : vector<8x4xf32> to vector<8x4xbf16>
    %c0_39 = arith.constant 0 : index
    %c24 = arith.constant 24 : index
    %133 = vector.load %arg6[%c0_39, %c24] : memref<8x32xbf16, #tpu.memory_space<vmem>>, vector<8x4xbf16>
    tpu.vector_store %arg6[%c0_39, %c24], %132 {strides = array<i32>} : memref<8x32xbf16, #tpu.memory_space<vmem>>, vector<8x4xbf16>,
    %134 = vector.extract_strided_slice %5 {offsets = [0, 28], sizes = [8, 4], strides = [1, 1]} : vector<8x32xbf16> to vector<8x4xbf16>
    %135 = vector.extract_strided_slice %6 {offsets = [0, 28], sizes = [8, 4], strides = [1, 1]} : vector<8x32xbf16> to vector<8x4xbf16>
    %136 = vector.extract_strided_slice %7 {offsets = [0, 28], sizes = [8, 4], strides = [1, 1]} : vector<8x32xbf16> to vector<8x4xbf16>
    %cst_40 = arith.constant dense<0.000000e+00> : vector<8x8xf32>
    %137 = tpu.matmul %134, %135, %cst_40 {dimension_numbers = #tpu.dot_dimension_numbers<[1], [1], [0], [0], [0, 0, 1, 0], [], []>} : vector<8x4xbf16>, vector<8x4xbf16>, vector<8x8xf32> -> vector<8x8xf32>
    %cst_41 = arith.constant dense<0xFF800000> : vector<8xf32>
    %138 = vector.multi_reduction <maximumf>, %137, %cst_41 [1] : vector<8x8xf32> to vector<8xf32>
    %139 = vector.shape_cast %138 : vector<8xf32> to vector<8x1xf32>
    %140 = vector.broadcast %139 : vector<8x1xf32> to vector<8x8xf32>
    %141 = arith.subf %137, %140 : vector<8x8xf32>
    %142 = math.exp %141 : vector<8x8xf32>
    %cst_42 = arith.constant dense<0.000000e+00> : vector<8xf32>
    %143 = vector.multi_reduction <add>, %142, %cst_42 [1] : vector<8x8xf32> to vector<8xf32>
    %144 = vector.shape_cast %143 : vector<8xf32> to vector<8x1xf32>
    %145 = tpu.reciprocal %144 {approx = true} : vector<8x1xf32> -> vector<8x1xf32>
    %146 = vector.broadcast %145 : vector<8x1xf32> to vector<8x8xf32>
    %147 = arith.mulf %142, %146 : vector<8x8xf32>
    %148 = arith.truncf %147 : vector<8x8xf32> to vector<8x8xbf16>
    %cst_43 = arith.constant dense<0.000000e+00> : vector<8x4xf32>
    %149 = tpu.matmul %148, %136, %cst_43 {dimension_numbers = #tpu.dot_dimension_numbers<[1], [0], [0], [1], [0, 0, 1, 1], [], []>} : vector<8x8xbf16>, vector<8x4xbf16>, vector<8x4xf32> -> vector<8x4xf32>
    %150 = arith.truncf %149 : vector<8x4xf32> to vector<8x4xbf16>
    %c0_44 = arith.constant 0 : index
    %c28 = arith.constant 28 : index
    %151 = vector.load %arg6[%c0_44, %c28] : memref<8x32xbf16, #tpu.memory_space<vmem>>, vector<8x4xbf16>
    tpu.vector_store %arg6[%c0_44, %c28], %150 {strides = array<i32>} : memref<8x32xbf16, #tpu.memory_space<vmem>>, vector<8x4xbf16>,
    %c0_45 = arith.constant 0 : index
    %c0_46 = arith.constant 0 : index
    %152 = vector.load %arg6[%c0_45, %c0_46] : memref<8x32xbf16, #tpu.memory_space<vmem>>, vector<8x32xbf16>
    %c0_47 = arith.constant 0 : index
    %c0_48 = arith.constant 0 : index
    %153 = vector.load %arg3[%c0_47, %c0_48] : memref<32x32xbf16, #tpu.memory_space<vmem>>, vector<32x32xbf16>
    %cst_49 = arith.constant dense<0.000000e+00> : vector<8x32xf32>
    %154 = tpu.matmul %152, %153, %cst_49 {dimension_numbers = #tpu.dot_dimension_numbers<[1], [0], [0], [1], [0, 0, 1, 1], [], []>} : vector<8x32xbf16>, vector<32x32xbf16>, vector<8x32xf32> -> vector<8x32xf32>
    %c0_50 = arith.constant 0 : index
    %c0_51 = arith.constant 0 : index
    %155 = vector.load %arg4[%c0_50, %c0_51] : memref<1x32xf32, #tpu.memory_space<vmem>>, vector<1x32xf32>
    %156 = vector.broadcast %155 : vector<1x32xf32> to vector<8x32xf32>
    %157 = arith.addf %154, %156 : vector<8x32xf32>
    %158 = vector.shape_cast %157 : vector<8x32xf32> to vector<1x8x32xf32>
    %c0_52 = arith.constant 0 : index
    %c0_53 = arith.constant 0 : index
    %c0_54 = arith.constant 0 : index
    %159 = vector.load %arg5[%c0_52, %c0_53, %c0_54] : memref<1x8x32xf32, #tpu.memory_space<vmem>>, vector<1x8x32xf32>
    tpu.vector_store %arg5[%c0_52, %c0_53, %c0_54], %158 {strides = array<i32>} : memref<1x8x32xf32, #tpu.memory_space<vmem>>, vector<1x8x32xf32>,
    return
  }
  func.func @transform_0(%arg0: i32) -> (i32, i32, i32) {
    %c0_i32 = arith.constant 0 : i32
    %c0_i32_0 = arith.constant 0 : i32
    %c0_i32_1 = arith.constant 0 : i32
    return %arg0, %c0_i32, %c0_i32_0 : i32, i32, i32
  }
  func.func @transform_1(%arg0: i32) -> (i32, i32) {
    %c0_i32 = arith.constant 0 : i32
    %c0_i32_0 = arith.constant 0 : i32
    %c0_i32_1 = arith.constant 0 : i32
    return %c0_i32, %c0_i32_0 : i32, i32
  }
  func.func @transform_2(%arg0: i32) -> (i32, i32) {
    %c0_i32 = arith.constant 0 : i32
    %c0_i32_0 = arith.constant 0 : i32
    %c0_i32_1 = arith.constant 0 : i32
    return %c0_i32, %c0_i32_0 : i32, i32
  }
  func.func @transform_3(%arg0: i32) -> (i32, i32) {
    %c0_i32 = arith.constant 0 : i32
    %c0_i32_0 = arith.constant 0 : i32
    %c0_i32_1 = arith.constant 0 : i32
    return %c0_i32, %c0_i32_0 : i32, i32
  }
  func.func @transform_4(%arg0: i32) -> (i32, i32, i32) {
    %c0_i32 = arith.constant 0 : i32
    %c0_i32_0 = arith.constant 0 : i32
    %c0_i32_1 = arith.constant 0 : i32
    return %arg0, %c0_i32, %c0_i32_0 : i32, i32, i32
  }
}

</mosaic_0001>

<bundles_post_ra>
// kernel: tpu_custom_call.1
= control target key start
LH: loop header
LB: loop body
LE: loop exit
PB: predicated region body
PF: predicated region fallthrough
CT: control target
= control target key end

     0   :  { %9 = vsyncpa [#allocation4], 0  ;;  %s2391_s0 = inlined_call_operand.hbm [shape: bf16[2,8,32], index: 0, kind: input, shape index: {}]   ;;  %s2392_s1 = inlined_call_operand.hbm [shape: bf16[32,96], index: 1, kind: input, shape index: {}]   ;;  %s2393_s2 = inlined_call_operand.hbm [shape: bf16[32,32], index: 2, kind: input, shape index: {}]   ;;  %s2394_s3 = inlined_call_operand.vmem [shape: f32[1,32], index: 3, kind: input, shape index: {}]   ;;  %s2395_s4 = inlined_call_operand.hbm [shape: f32[2,8,32], index: 4, kind: output, shape index: {}]  }
   0x1   :  { %11 = vsyncpa [#allocation4 + $0x1], 0 }
   0x2   :  { %12 = vsyncpa [#allocation7], 0 }
   0x3   :  { %13 = vsyncpa [#allocation5], 0 }
   0x4   :  { %15 = vsyncpa [#allocation5 + $0x1], 0  ;;  %s1985_s15 = smov 0   ;;  %s1987_s16 = smov 0  }
   0x5   :  { %s1989_s17 = smov 0   ;;  %s1991_s18 = smov 0  }
   0x6 LB: > { %s2006_s19 = sadd.s32 4294967295, %s1920_s18   ;;  %s1424_s20 = sadd.s32 4294967294, %s1920_s18   ;;  %s1920_s18 = sphi %s1991_s18, %s2415_s18   ;;  %s1916_s17 = sphi %s1989_s17, %s2414_s17   ;;  %s1912_s16 = sphi %s1987_s16, %s2413_s16   ;;  %s1908_s15 = sphi %s1985_s15, %s2412_s15  }
   0x7   : > { %p41_p0 = scmp.ne.s32.totalorder %s1912_s16, %s1908_s15  ;;  %p2396_p1 = scmp.eq.s32.totalorder %s2006_s19, 0 }
   0x8   : > { %p134_p3 = scmp.eq.s32.totalorder %s1424_s20, 1  ;;  %p1425_p5 = scmp.ge.s32.totalorder %s1920_s18, 1 }
   0x9   : > { %p2015_p4 = por %p2396_p1, %p41_p0  ;;  %p141_p7 = scmp.lt.s32.totalorder %s1920_s18, 3 }
   0xa   : > { %p2020_p6 = por %p134_p3, %p41_p0  ;;  %s1922_s24 = smov [#allocation6]  }
   0xb   : > { %s2399_s21 = scalar_select %p2015_p4, 1, 0 }
   0xc   : > { %s2400_s22 = scalar_select %p2020_p6, 1, 0 }
   0xd   : > { %p2025_p8 = pnand %p1425_p5, %p141_p7  ;;  %s153_s25 = sshll.u32 %s1922_s24, 4  ;;  %s2029_s25 = int_to_ptr.vmem [resolvable:$true] %s153_s25 }
   0xe   : > { %s1923_s27 = smov [#allocation8]   ;;  %s1764_s5 = scalar_lea.hbm %s2392_s1, 256 }
   0xf   : > { %p1639_p9 = pneg %p2025_p8  ;;  %s166_s28 = sshll.u32 %s1923_s27, 4  ;;  %s2040_s28 = int_to_ptr.vmem [resolvable:$true] %s166_s28 }
  0x10   : > { %p1765_p12 = scmp.ne.s32.totalorder %s2392_s1, %s1764_s5  ;;  %p1771_p5 = scmp.lt.u32.totalorder %s1764_s5, %s2392_s1 }
  0x11   : > { %p2036_p11 = pnand %p1639_p9, %p2396_p1 }
  0x13   : > { %p1766_p13 = pneg %p2036_p11 }
  0x15   : > { %p1767_p0 = pnand %p1766_p13, %p1765_p12 }
  0x17   : > { %p1768_p3 = pneg %p1767_p0 }
  0x19   : > { %p1773_p7 = pnand %p1771_p5, %p1768_p3 }
  0x1b   : > { %1776 = shalt.err (!%p1773_p7)
}
  0x1c   : > { %s1777_s10 = scalar_lea.vmem %s2029_s25, 256  ;;  %p1785_p2 = scmp.lt.s32.totalorder %s2029_s25, %s2029_s25 }
  0x1d   : > { %p1778_p9 = scmp.ne.s32.totalorder %s2029_s25, %s1777_s10  ;;  %p1786_p12 = scmp.lt.s32.totalorder %s1777_s10, %s1777_s10 }
  0x1f   : > { %p1780_p10 = pnand %p1778_p9, %p1766_p13  ;;  %p1787_p0 = por %p1786_p12, %p1785_p2 }
  0x21   : > { %p1781_p1 = pneg %p1780_p10 }
  0x23   : > { %p1788_p6 = pnand %p1787_p0, %p1781_p1 }
  0x25   : > { %1791 = shalt.err (!%p1788_p6)
}
  0x26   : > { %s1924_s11 = smov 64   ;;  %s1925_s12 = smov 4  }
  0x27   : > { %1642 = dma.hbm_to_vmem [thread:$0]  (!%p2036_p11), %s2392_s1, 256, %s2029_s25, [#allocation7], %s1924_s11, %s1924_s11, %s1925_s12  }
  0x28   : > { %s1792_s27 = scalar_lea.hbm %s2393_s2, 256 }
  0x29   : > { %p1793_p2 = scmp.ne.s32.totalorder %s2393_s2, %s1792_s27  ;;  %p1799_p10 = scmp.lt.u32.totalorder %s1792_s27, %s2393_s2 }
  0x2b   : > { %p1795_p1 = pnand %p1793_p2, %p1766_p13 }
  0x2d   : > { %p1796_p6 = pneg %p1795_p1 }
  0x2f   : > { %p1801_p3 = pnand %p1799_p10, %p1796_p6 }
  0x31   : > { %1804 = shalt.err (!%p1801_p3)
}
  0x32   : > { %s1805_s25 = scalar_lea.vmem %s2040_s28, 256  ;;  %p1813_p12 = scmp.lt.s32.totalorder %s2040_s28, %s2040_s28 }
  0x33   : > { %p1806_p5 = scmp.ne.s32.totalorder %s2040_s28, %s1805_s25  ;;  %p1814_p0 = scmp.lt.s32.totalorder %s1805_s25, %s1805_s25 }
  0x35   : > { %p1808_p7 = pnand %p1806_p5, %p1766_p13  ;;  %p1815_p2 = por %p1814_p0, %p1813_p12 }
  0x37   : > { %p1809_p9 = pneg %p1808_p7 }
  0x39   : > { %p1816_p1 = pnand %p1815_p2, %p1809_p9 }
  0x3b   : > { %1819 = shalt.err (!%p1816_p1)
}
  0x3c   : > { %1645 = dma.hbm_to_vmem [thread:$0]  (!%p2036_p11), %s2393_s2, 256, %s2040_s28, [#allocation7], %s1924_s11, %s1924_s11, %s1925_s12  }
  0x3d   : > { %s2095_s9 = sadd.s32 1, %s1920_s18   ;;  %s28_s26 = sadd.s32 1, %s1916_s17 }
  0x3e   : > { %s25_s10 = ssub.s32 %s1920_s18, %s2095_s9  ;;  %p35_p13 = scmp.ne.s32.totalorder %s1916_s17, %s1912_s16 }
  0x3f   : > { %p26_p6 = scmp.eq.s32.totalorder %s25_s10, 0  ;;  %p36_p10 = scmp.eq.s32.totalorder %s1920_s18, 0 }
  0x40   : > { %p2403_p3 = scmp.eq.s32.totalorder %s2006_s19, 1  ;;  %p1656_p7 = scmp.lt.s32.totalorder %s1920_s18, 2 }
  0x41   : > { %s2111_s14 = scalar_select %p26_p6, %s1916_s17, %s28_s26  }
  0x42   : > { %p2105_p5 = por %p2403_p3, %p35_p13  ;;  %p37_p9 = por %p36_p10, %p35_p13 }
  0x43   : > { %s183_s20 = sand.u32 1, %s1916_s17   ;;  %s1430_s28 = sshll.u32 %s1920_s18, 6 }
  0x44   : > { %s2404_s13 = scalar_select %p2105_p5, 1, 0 }
  0x45   : > { %s1429_s24 = sshll.u32 %s183_s20, 2  ;;  %s2118_s27 = scalar_lea.hbm %s2391_s0, %s1430_s28 }
  0x46   : > { %s187_s29 = scalar_lea.vmem [#allocation3], %s1429_s24  ;;  %p2122_p11 = pnand %p1656_p7, %p37_p9 }
  0x47   : > { %s194_s30 = sshll.u32 %s187_s29, 4  ;;  %s184_s6 = scalar_lea.sflag [#allocation4], %s183_s20  ;;  %s2120_s30 = int_to_ptr.vmem [resolvable:$true] %s194_s30 }
  0x48   : > { %s1820_s25 = scalar_lea.hbm %s2118_s27, 64  ;;  %p1822_p0 = pneg %p2122_p11 }
  0x49   : > { %p1821_p12 = scmp.ne.s32.totalorder %s2118_s27, %s1820_s25  ;;  %s1825_s26 = scalar_lea.hbm %s2391_s0, 128 }
  0x4a   : > { %p1826_p13 = scmp.lt.u32.totalorder %s2118_s27, %s2391_s0  ;;  %p1827_p6 = scmp.lt.u32.totalorder %s1825_s26, %s1820_s25 }
  0x4b   : > { %p1823_p2 = pnand %p1822_p0, %p1821_p12  ;;  %p1829_p3 = scmp.lt.u32.totalorder %s1820_s25, %s2118_s27 }
  0x4c   : > { %p1828_p10 = por %p1827_p6, %p1826_p13 }
  0x4d   : > { %p1824_p1 = pneg %p1823_p2 }
  0x4e   : > { %p1830_p7 = por %p1829_p3, %p1828_p10 }
  0x50   : > { %p1831_p9 = pnand %p1830_p7, %p1824_p1 }
  0x52   : > { %1834 = shalt.err (!%p1831_p9)
}
  0x53   : > { %s1835_s20 = scalar_lea.vmem %s2120_s30, 64  ;;  %s1926_s28 = smov [#allocation3]  }
  0x54   : > { %p1836_p12 = scmp.ne.s32.totalorder %s2120_s30, %s1835_s20  ;;  %s1840_s11 = sshll.u32 %s1926_s28, 4  ;;  %s1841_s11 = int_to_ptr.vmem [resolvable:$false] %s1840_s11 }
  0x55   : > { %s1842_s12 = scalar_lea.vmem %s1841_s11, 128  ;;  %p1843_p4 = scmp.lt.s32.totalorder %s2120_s30, %s1841_s11 }
  0x56   : > { %p1838_p2 = pnand %p1836_p12, %p1822_p0  ;;  %p1844_p13 = scmp.lt.s32.totalorder %s1842_s12, %s1835_s20 }
  0x58   : > { %p1839_p5 = pneg %p1838_p2  ;;  %p1845_p6 = por %p1844_p13, %p1843_p4 }
  0x5a   : > { %p1846_p10 = pnand %p1845_p6, %p1839_p5 }
  0x5c   : > { %1849 = shalt.err (!%p1846_p10)
}
  0x5d   : > { %1649 = dma.hbm_to_vmem [thread:$0]  (!%p2122_p11), %s2118_s27, 64, %s2120_s30, %s184_s6  }
  0x5e   : > { %203 = sbr.rel (%p2025_p8) target bundleno = 1655 (0x677), region = 36  ;;  %s2154_s29 = sand.u32 (!%p2025_p8), 1, %s1912_s16  }
  0x5f   : > { %s1432_s25 = sshll.u32 (!%p2025_p8), %s2154_s29, 2  ;;  %s206_s7 = scalar_lea.sflag (!%p2025_p8), [#allocation4], %s2154_s29 }
  0x60   : > { %s209_s8 = scalar_lea.vmem (!%p2025_p8), [#allocation3], %s1432_s25  ;;  %p2406_p4 = scmp.ne.s32.totalorder (!%p2025_p8), %s2399_s21, 0 }
  0x65   : > { %1895 = dma.done.wait (%p2406_p4), %s206_s7, 64  }
  0x66   : > { %1897 = vsyncadd (%p2406_p4), %s206_s7, 4294967232  ;;  %p2407_p5 = scmp.eq.s32.totalorder %s2006_s19, 0 }
  0x68   : > { %1899 = dma.done.wait (%p2407_p5), [#allocation7], 512   ;;  %p2408_p11 = pmov %p2407_p5 }
  0x69   : > { %v1927_v0 = vmov 0.0   ;;  %vm1928_vm0 = vmmov 0   ;;  %v1728_v1 = vld [vmem:[#allocation6] sm:$0xff]   ;;  %v1729_v2 = vld [vmem:[#allocation6 + $0x8] sm:$0xff]   ;;  %v243_v3 = vld [vmem:[%s209_s8] sm:$0xf] }
  0x6a   : > { %1901 = vsyncadd (%p2408_p11), [#allocation7], 4294966784  ;;  %1515 = vmatprep.subr.bf16.mxu0 %v1927_v0  ;;  %1519 = vmatprep.mubr.msk.bf16.mxu0 %vm1928_vm0, %v1927_v0  ;;  %vm260_vm1 = vcmask 261120   ;;  %s1929_s21 = smov 124   ;;  %s1930_s23 = smov 96   ;;  %vm308_vm2 = vcmask 31744  }
  0x6b   : > { %1523 = vmatprep.subr.bf16.mxu1 %v1927_v0  ;;  %1525 = vmatprep.mubr.msk.bf16.mxu1 %vm1928_vm0, %v1927_v0  ;;  %s1931_s27 = smov 88   ;;  %s1932_s30 = smov 92   ;;  %vm355_vm3 = vcmask 64512   ;;  %vm373_vm4 = vcmask 1043456   ;;  %vm418_vm5 = vcmask 27648   ;;  %vm537_vm6 = vcmask 60448  }
  0x6c   : > { %1516 = vmatpush3.bf16.msra.mxu0 %v1728_v1  ;;  %s1933_s5 = smov 84   ;;  %s1934_s6 = smov 120   ;;  %vm656_vm7 = vcmask 93248   ;;  %vm775_vm8 = vcmask 126048   ;;  %vm894_vm9 = vcmask 158848   ;;  %vm1013_vm10 = vcmask 191648  }
  0x6d   : > { %1517 = vmatprep.subr.bf16.mxu0 %v1927_v0  ;;  %s1935_s26 = smov 80   ;;  %s1936_s10 = smov 116   ;;  %vm1132_vm11 = vcmask 224448   ;;  %vm1251_vm12 = vcmask 257248  }
  0x6e   : > { %s1937_s24 = smov 76   ;;  %s1938_s20 = smov 112  }
  0x6f   : > { %s1939_s28 = smov 72   ;;  %s1940_s11 = smov 108  }
  0x70   : > { %1518 = vmatpush3.bf16.msra.mxu0 %v1729_v2  ;;  %s1941_s12 = smov 68   ;;  %s1942_s25 = smov 104  }
  0x71   : > { %1529 = vmatprep.subr.bf16.mxu0 %v1927_v0  ;;  %s1943_s7 = smov 100   ;;  %s1944_s8 = smov 60  }
  0x72   : > { %p2409_p0 = scmp.ne.s32.totalorder %s2404_s13, 0 }
  0x73   : > { %1520 = vmatmul.mubr.msk.bf16.vlgmr.msra.gmra.mrb[0].mxu0 %vm260_vm1, %v243_v3 }
  0x74   : > { %1531 = vmatprep.mubr.msk.bf16.mxu0 %vm1928_vm0, %v1927_v0 }
 0x146   : > { %v298_v4 = vpop.f32.mrb[0].mxu0 }
 0x147   : > { %v2177_v5 = vpack.c.bf16 %v298_v4, %v298_v4  ;;  %v1521_v6 = vpop.f32.mrb[1].mxu0 }
 0x148   : > { %v301_v7 = vpop.f32.mrb[2].mxu0 }
 0x149   : > { %420 = vrot.lane.b32.xlu1 %v2177_v5, %s1929_s21  ;;  %306 = vrot.lane.b32.xlu0 %v2177_v5, %s1930_s23  ;;  %v1522_v8 = vpop.f32.mrb[3].mxu0  ;;  %s1945_s21 = smov 64   ;;  %s1946_s23 = smov 56  }
 0x14d   : > { %541 = vrot.lane.b32.xlu1 %v2177_v5, %s1931_s27  ;;  %422 = vrot.lane.b32.xlu0 %v2177_v5, %s1932_s30  ;;  %s1947_s27 = smov 52   ;;  %s1948_s30 = smov 44  }
 0x151   : > { %660 = vrot.lane.b32.xlu1 %v2177_v5, %s1933_s5  ;;  %539 = vrot.lane.b32.xlu0 %v2177_v5, %s1934_s6  ;;  %s1949_s5 = smov 40   ;;  %s1950_s6 = smov 36  }
 0x155   : > { %779 = vrot.lane.b32.xlu1 %v2177_v5, %s1935_s26  ;;  %658 = vrot.lane.b32.xlu0 %v2177_v5, %s1936_s10  ;;  %s1951_s26 = smov 48   ;;  %s1952_s10 = smov 4  }
 0x159   : > { %898 = vrot.lane.b32.xlu1 %v2177_v5, %s1937_s24  ;;  %777 = vrot.lane.b32.xlu0 %v2177_v5, %s1938_s20  ;;  %s1953_s24 = smov 8   ;;  %s1954_s20 = smov 12  }
 0x15d   : > { %1017 = vrot.lane.b32.xlu1 %v2177_v5, %s1939_s28  ;;  %896 = vrot.lane.b32.xlu0 %v2177_v5, %s1940_s11  ;;  %s1955_s28 = smov 16   ;;  %s1956_s11 = smov 20  }
 0x161   : > { %1136 = vrot.lane.b32.xlu1 %v2177_v5, %s1941_s12  ;;  %1015 = vrot.lane.b32.xlu0 %v2177_v5, %s1942_s25  ;;  %s1957_s12 = smov 24   ;;  %s1958_s25 = smov 28  }
 0x165   : > { %1134 = vrot.lane.b32.xlu0 %v2177_v5, %s1943_s7  ;;  %s1435_s7 = sshll.u32 %s2154_s29, 3 }
 0x1bb   : > { %v307_v9 = vpop.permute.xlu0 %306  ;;  %v421_v12 = vpop.permute.xlu1 %420 }
 0x1bc   : > { %v313_v10 = vsel %vm308_vm2, %v307_v9, 0 }
 0x1bd   : > { %1524 = vmatpush3.bf16.xpose.msra.mxu1 %v313_v10 }
 0x1be   : > { %1535 = vmatprep.subr.bf16.mxu1 %v1927_v0 }
 0x1bf   : > { %v423_v11 = vpop.permute.xlu0 %422  ;;  %v542_v14 = vpop.permute.xlu1 %541 }
 0x1c0   : > { %v428_v13 = vsel %vm308_vm2, %v423_v11, 0  ;;  %v547_v15 = vsel %vm308_vm2, %v542_v14, 0 }
 0x1c3   : > { %v661_v16 = vpop.permute.xlu1 %660  ;;  %v540_v17 = vpop.permute.xlu0 %539 }
 0x1c4   : > { %1526 = vmatmul.mubr.msk.bf16.vlgmr.msra.gmra.mrb[0].mxu1 %vm308_vm2, %v2177_v5  ;;  %v666_v18 = vsel %vm308_vm2, %v661_v16, 0 }
 0x1c5   : > { %1536 = vmatpush3.bf16.xpose.msra.mxu1 %v428_v13  ;;  %1537 = vmatprep.mubr.msk.bf16.mxu1 %vm1928_vm0, %v1927_v0 }
 0x1c6   : > { %1547 = vmatprep.subr.bf16.mxu1 %v1927_v0 }
 0x1c7   : > { %v780_v19 = vpop.permute.xlu1 %779  ;;  %v659_v20 = vpop.permute.xlu0 %658 }
 0x1c8   : > { %v785_v21 = vsel %vm308_vm2, %v780_v19, 0 }
 0x1cb   : > { %v899_v22 = vpop.permute.xlu1 %898  ;;  %v778_v23 = vpop.permute.xlu0 %777 }
 0x1cc   : > { %1538 = vmatmul.mubr.msk.bf16.vlgmr.msra.gmra.mrb[4].mxu1 %vm308_vm2, %v421_v12  ;;  %v904_v24 = vsel %vm308_vm2, %v899_v22, 0 }
 0x1cd   : > { %1548 = vmatpush3.bf16.xpose.msra.mxu1 %v547_v15  ;;  %1549 = vmatprep.mubr.msk.bf16.mxu1 %vm1928_vm0, %v1927_v0 }
 0x1ce   : > { %1559 = vmatprep.subr.bf16.mxu1 %v1927_v0 }
 0x1cf   : > { %v1018_v25 = vpop.permute.xlu1 %1017  ;;  %v897_v26 = vpop.permute.xlu0 %896 }
 0x1d0   : > { %v1023_v27 = vsel %vm308_vm2, %v1018_v25, 0 }
 0x1d3   : > { %v1137_v28 = vpop.permute.xlu1 %1136  ;;  %v1016_v29 = vpop.permute.xlu0 %1015 }
 0x1d4   : > { %1550 = vmatmul.mubr.msk.bf16.vlgmr.msra.gmra.mrb[8].mxu1 %vm308_vm2, %v540_v17  ;;  %v1142_v30 = vsel %vm308_vm2, %v1137_v28, 0 }
 0x1d5   : > { %1560 = vmatpush3.bf16.xpose.msra.mxu1 %v666_v18  ;;  %1561 = vmatprep.mubr.msk.bf16.mxu1 %vm1928_vm0, %v1927_v0 }
 0x1d6   : > { %1571 = vmatprep.subr.bf16.mxu1 %v1927_v0 }
 0x1d7   : > { %v1135_v31 = vpop.permute.xlu0 %1134 }
 0x1dc   : > { %1562 = vmatmul.mubr.msk.bf16.vlgmr.msra.gmra.mrb[12].mxu1 %vm308_vm2, %v659_v20 }
 0x1dd   : > { %1572 = vmatpush3.bf16.xpose.msra.mxu1 %v785_v21  ;;  %1573 = vmatprep.mubr.msk.bf16.mxu1 %vm1928_vm0, %v1927_v0 }
 0x1de   : > { %1583 = vmatprep.subr.bf16.mxu1 %v1927_v0 }
 0x1e4   : > { %1574 = vmatmul.mubr.msk.bf16.vlgmr.msra.gmra.mrb[16].mxu1 %vm308_vm2, %v778_v23 }
 0x1e5   : > { %1584 = vmatpush3.bf16.xpose.msra.mxu1 %v904_v24  ;;  %1585 = vmatprep.mubr.msk.bf16.mxu1 %vm1928_vm0, %v1927_v0 }
 0x1e6   : > { %1595 = vmatprep.subr.bf16.mxu1 %v1927_v0 }
 0x1ec   : > { %1586 = vmatmul.mubr.msk.bf16.vlgmr.msra.gmra.mrb[20].mxu1 %vm308_vm2, %v897_v26 }
 0x1ed   : > { %1596 = vmatpush3.bf16.xpose.msra.mxu1 %v1023_v27  ;;  %1597 = vmatprep.mubr.msk.bf16.mxu1 %vm1928_vm0, %v1927_v0 }
 0x1ee   : > { %1607 = vmatprep.subr.bf16.mxu1 %v1927_v0 }
 0x1f4   : > { %1598 = vmatmul.mubr.msk.bf16.vlgmr.msra.gmra.mrb[24].mxu1 %vm308_vm2, %v1016_v29 }
 0x1f5   : > { %1608 = vmatpush3.bf16.xpose.msra.mxu1 %v1142_v30  ;;  %1609 = vmatprep.mubr.msk.bf16.mxu1 %vm1928_vm0, %v1927_v0 }
 0x1f6   : > { %1619 = vmatprep.subr.bf16.mxu1 %v1927_v0 }
 0x1fc   : > { %1610 = vmatmul.mubr.msk.bf16.vlgmr.msra.gmra.mrb[28].mxu1 %vm308_vm2, %v1135_v31 }
 0x1fd   : > { %1623 = vmatprep.mubr.msk.bf16.mxu1 %vm1928_vm0, %v1927_v0 }
 0x297   : > { %v349_v32 = vpop.f32.mrb[0].mxu1 }
 0x298   : > { %v1527_v33 = vpop.f32.mrb[1].mxu1  ;;  %v356_v34 = vsel %vm355_vm3, %v349_v32, -inf }
 0x299   : > { %357 = vmax.xlane.f32.xlu1 %v356_v34  ;;  %v352_v35 = vpop.f32.mrb[2].mxu1 }
 0x29a   : > { %v1528_v36 = vpop.f32.mrb[3].mxu1 }
 0x29f   : > { %v464_v37 = vpop.f32.mrb[4].mxu1 }
 0x2a0   : > { %v1539_v38 = vpop.f32.mrb[5].mxu1  ;;  %v470_v39 = vsel %vm355_vm3, %v464_v37, -inf }
 0x2a1   : > { %471 = vmax.xlane.f32.xlu0 %v470_v39  ;;  %v467_v40 = vpop.f32.mrb[6].mxu1 }
 0x2a2   : > { %v1540_v41 = vpop.f32.mrb[7].mxu1 }
 0x2a7   : > { %v583_v42 = vpop.f32.mrb[8].mxu1 }
 0x2a8   : > { %v1551_v43 = vpop.f32.mrb[9].mxu1  ;;  %v589_v44 = vsel %vm355_vm3, %v583_v42, -inf }
 0x2a9   : > { %590 = vmax.xlane.f32.xlu0 %v589_v44  ;;  %v586_v45 = vpop.f32.mrb[10].mxu1 }
 0x2aa   : > { %v1552_v46 = vpop.f32.mrb[11].mxu1 }
 0x2af   : > { %v702_v47 = vpop.f32.mrb[12].mxu1 }
 0x2b0   : > { %v1563_v48 = vpop.f32.mrb[13].mxu1  ;;  %v708_v49 = vsel %vm355_vm3, %v702_v47, -inf }
 0x2b1   : > { %709 = vmax.xlane.f32.xlu1 %v708_v49  ;;  %v705_v50 = vpop.f32.mrb[14].mxu1 }
 0x2b2   : > { %v1564_v51 = vpop.f32.mrb[15].mxu1 }
 0x2b7   : > { %v821_v52 = vpop.f32.mrb[16].mxu1 }
 0x2b8   : > { %v1575_v53 = vpop.f32.mrb[17].mxu1  ;;  %v827_v54 = vsel %vm355_vm3, %v821_v52, -inf }
 0x2b9   : > { %828 = vmax.xlane.f32.xlu0 %v827_v54  ;;  %v824_v55 = vpop.f32.mrb[18].mxu1 }
 0x2ba   : > { %v1576_v56 = vpop.f32.mrb[19].mxu1 }
 0x2bf   : > { %v2240_v57 = vpop.f32.mrb[20].mxu1 }
 0x2c0   : > { %v1587_v58 = vpop.f32.mrb[21].mxu1  ;;  %v946_v59 = vsel %vm355_vm3, %v2240_v57, -inf }
 0x2c1   : > { %947 = vmax.xlane.f32.xlu1 %v946_v59  ;;  %v943_v60 = vpop.f32.mrb[22].mxu1 }
 0x2c2   : > { %v1588_v61 = vpop.f32.mrb[23].mxu1 }
 0x2c7   : > { %v1059_v62 = vpop.f32.mrb[24].mxu1 }
 0x2c8   : > { %v1599_v63 = vpop.f32.mrb[25].mxu1  ;;  %v1065_v1 = vsel %vm355_vm3, %v1059_v62, -inf }
 0x2c9   : > { %1066 = vmax.xlane.f32.xlu0 %v1065_v1  ;;  %v1062_v2 = vpop.f32.mrb[26].mxu1 }
 0x2ca   : > { %v1600_v3 = vpop.f32.mrb[27].mxu1 }
 0x2cf   : > { %v2245_v4 = vpop.f32.mrb[28].mxu1 }
 0x2d0   : > { %v1611_v6 = vpop.f32.mrb[29].mxu1  ;;  %v1184_v9 = vsel %vm355_vm3, %v2245_v4, -inf }
 0x2d1   : > { %v1181_v7 = vpop.f32.mrb[30].mxu1 }
 0x2d2   : > { %482 = vrot.lane.b32.xlu1 %v2177_v5, %s1944_s8  ;;  %v1612_v8 = vpop.f32.mrb[31].mxu1 }
 0x2df   : > { %368 = vrot.lane.b32.xlu0 %v2177_v5, %s1945_s21 }
 0x2f6   : > { %1185 = vmax.xlane.f32.xlu1 %v1184_v9 }
 0x307   : > { %601 = vrot.lane.b32.xlu1 %v2177_v5, %s1946_s23  ;;  %s1467_s23 = sshll.u32 %s2006_s19, 7  ;;  %s1322_s19 = scalar_lea.sflag [#allocation5], %s2154_s29 }
 0x326   : > { %v358_v10 = vpop.xlane.xlu1 %357 }
 0x327   : > { %v359_v11 = vsub.f32 %v349_v32, %v358_v10 }
 0x329   : > { %v360_v12 = vmul.f32 1.442695, %v359_v11 }
 0x32b   : > { %1732 = vpow2.f32 %v360_v12 }
 0x32e   : > { %v472_v13 = vpop.xlane.xlu0 %471 }
 0x32f   : > { %v473_v14 = vsub.f32 %v464_v37, %v472_v13 }
 0x331   : > { %v474_v15 = vmul.f32 1.442695, %v473_v14 }
 0x333   : > { %1734 = vpow2.f32 %v474_v15 }
 0x335   : > { %v2252_v16 = vpop.eup %1732 }
 0x336   : > { %v591_v17 = vpop.xlane.xlu0 %590  ;;  %v362_v18 = vsel %vm355_vm3, %v2252_v16, 0.0 }
 0x337   : > { %v592_v19 = vsub.f32 %v583_v42, %v591_v17  ;;  %363 = vadd.xlane.f32.xlu0 %v362_v18 }
 0x339   : > { %v593_v20 = vmul.f32 1.442695, %v592_v19 }
 0x33b   : > { %1736 = vpow2.f32 %v593_v20 }
 0x33d   : > { %v2256_v21 = vpop.eup %1734 }
 0x33e   : > { %v710_v22 = vpop.xlane.xlu1 %709  ;;  %v476_v23 = vsel %vm355_vm3, %v2256_v21, 0.0 }
 0x33f   : > { %v711_v24 = vsub.f32 %v702_v47, %v710_v22  ;;  %477 = vadd.xlane.f32.xlu1 %v476_v23 }
 0x341   : > { %v712_v25 = vmul.f32 1.442695, %v711_v24 }
 0x343   : > { %1738 = vpow2.f32 %v712_v25 }
 0x345   : > { %v2260_v26 = vpop.eup %1736 }
 0x346   : > { %v829_v27 = vpop.xlane.xlu0 %828  ;;  %v595_v28 = vsel %vm355_vm3, %v2260_v26, 0.0 }
 0x347   : > { %v830_v29 = vsub.f32 %v821_v52, %v829_v27  ;;  %596 = vadd.xlane.f32.xlu0 %v595_v28 }
 0x349   : > { %v831_v30 = vmul.f32 1.442695, %v830_v29 }
 0x34b   : > { %1740 = vpow2.f32 %v831_v30 }
 0x34d   : > { %v2264_v31 = vpop.eup %1738 }
 0x34e   : > { %v714_v32 = vsel %vm355_vm3, %v2264_v31, 0.0  ;;  %v948_v40 = vpop.xlane.xlu1 %947 }
 0x34f   : > { %715 = vadd.xlane.f32.xlu1 %v714_v32  ;;  %v949_v42 = vsub.f32 %v2240_v57, %v948_v40 }
 0x351   : > { %v950_v44 = vmul.f32 1.442695, %v949_v42 }
 0x352   : > { %v483_v47 = vpop.permute.xlu1 %482 }
 0x353   : > { %v488_v59 = vsel %vm373_vm4, %v483_v47, 0 }
 0x355   : > { %v2268_v33 = vpop.eup %1740 }
 0x356   : > { %v1067_v34 = vpop.xlane.xlu0 %1066  ;;  %v833_v35 = vsel %vm355_vm3, %v2268_v33, 0.0 }
 0x357   : > { %v1068_v36 = vsub.f32 %v1059_v62, %v1067_v34  ;;  %834 = vadd.xlane.f32.xlu1 %v833_v35 }
 0x359   : > { %v1069_v37 = vmul.f32 1.442695, %v1068_v36 }
 0x35a   : > { %v369_v38 = vpop.permute.xlu0 %368 }
 0x35b   : > { %1742 = vpow2.f32 %v1069_v37  ;;  %v375_v39 = vsel %vm373_vm4, %v369_v38, 0 }
 0x35c   : > { %1530 = vmatpush3.bf16.msra.mxu0 %v375_v39  ;;  %1744 = vpow2.f32 %v950_v44 }
 0x35d   : > { %720 = vrot.lane.b32.xlu0 %v2177_v5, %s1947_s27  ;;  %1541 = vmatprep.subr.bf16.mxu0 %v1927_v0  ;;  %s241_s27 = scalar_lea.vmem [#allocation9], %s1435_s7 }
 0x365   : > { %v2275_v41 = vpop.eup %1742 }
 0x366   : > { %v1071_v43 = vsel %vm355_vm3, %v2275_v41, 0.0  ;;  %v2280_v45 = vpop.eup %1744 }
 0x367   : > { %1072 = vadd.xlane.f32.xlu1 %v1071_v43  ;;  %v952_v46 = vsel %vm355_vm3, %v2280_v45, 0.0 }
 0x37c   : > { %953 = vadd.xlane.f32.xlu0 %v952_v46 }
 0x383   : > { %v1186_v48 = vpop.xlane.xlu1 %1185 }
 0x384   : > { %v1187_v49 = vsub.f32 %v2245_v4, %v1186_v48 }
 0x386   : > { %v1188_v50 = vmul.f32 1.442695, %v1187_v49 }
 0x387   : > { %v602_v54 = vpop.permute.xlu1 %601 }
 0x388   : > { %1746 = vpow2.f32 %v1188_v50  ;;  %v607_v63 = vsel %vm373_vm4, %v602_v54, 0 }
 0x392   : > { %v2285_v51 = vpop.eup %1746  ;;  %958 = vrot.lane.b32.xlu0 %v2177_v5, %s1948_s30  ;;  %s1335_s30 = sshll.u32 %s241_s27, 4  ;;  %s2348_s30 = int_to_ptr.vmem [resolvable:$true] %s1335_s30 }
 0x393   : > { %v1190_v52 = vsel %vm355_vm3, %v2285_v51, 0.0 }
 0x394   : > { %1191 = vadd.xlane.f32.xlu1 %v1190_v52 }
 0x396   : > { %1077 = vrot.lane.b32.xlu0 %v2177_v5, %s1949_s5 }
 0x39a   : > { %1196 = vrot.lane.b32.xlu0 %v2177_v5, %s1950_s6 }
 0x3a5   : > { %839 = vrot.lane.b32.xlu1 %v2177_v5, %s1951_s26  ;;  %s2346_s26 = scalar_lea.hbm %s2395_s4, %s1467_s23 }
 0x3c4   : > { %v364_v53 = vpop.xlane.xlu0 %363 }
 0x3c5   : > { %1748 = vrcp.f32 %v364_v53 }
 0x3cc   : > { %v478_v55 = vpop.xlane.xlu1 %477 }
 0x3cd   : > { %1750 = vrcp.f32 %v478_v55 }
 0x3cf   : > { %v1749_v56 = vpop.eup %1748 }
 0x3d0   : > { %v366_v57 = vmul.f32 %v1749_v56, %v2252_v16 }
 0x3d2   : > { %v367_v58 = vpack.c.bf16 %v366_v57, %v366_v57 }
 0x3d4   : > { %1532 = vmatmul.mubr.msk.bf16.vlgmr.msra.gmra.mrb[4].mxu0 %vm355_vm3, %v367_v58  ;;  %v597_v60 = vpop.xlane.xlu0 %596 }
 0x3d5   : > { %1542 = vmatpush3.bf16.msra.mxu0 %v488_v59  ;;  %1752 = vrcp.f32 %v597_v60  ;;  %1543 = vmatprep.mubr.msk.bf16.mxu0 %vm1928_vm0, %v1927_v0 }
 0x3d6   : > { %1553 = vmatprep.subr.bf16.mxu0 %v1927_v0 }
 0x3d7   : > { %v1751_v5 = vpop.eup %1750 }
 0x3d8   : > { %v480_v61 = vmul.f32 %v1751_v5, %v2256_v21  ;;  %v721_v4 = vpop.permute.xlu0 %720 }
 0x3d9   : > { %v726_v7 = vsel %vm373_vm4, %v721_v4, 0 }
 0x3da   : > { %v481_v62 = vpack.c.bf16 %v480_v61, %v480_v61 }
 0x3dc   : > { %v716_v1 = vpop.xlane.xlu1 %715  ;;  %1544 = vmatmul.mubr.msk.bf16.vlgmr.msra.gmra.mrb[8].mxu0 %vm355_vm3, %v481_v62 }
 0x3dd   : > { %1754 = vrcp.f32 %v716_v1  ;;  %1554 = vmatpush3.bf16.msra.mxu0 %v607_v63  ;;  %1555 = vmatprep.mubr.msk.bf16.mxu0 %vm1928_vm0, %v1927_v0  ;;  %v1730_v1 = vld [vmem:[#allocation8] sm:$0xff]  }
 0x3de   : > { %1565 = vmatprep.subr.bf16.mxu0 %v1927_v0  ;;  %1620 = vmatpush3.bf16.msra.mxu1 %v1730_v1 }
 0x3df   : > { %v1753_v2 = vpop.eup %1752  ;;  %1621 = vmatprep.subr.bf16.mxu1 %v1927_v0 }
 0x3e0   : > { %v599_v3 = vmul.f32 %v1753_v2, %v2260_v26 }
 0x3e2   : > { %v600_v6 = vpack.c.bf16 %v599_v3, %v599_v3  ;;  %v1731_v3 = vld [vmem:[#allocation8 + $0x8] sm:$0xff]  }
 0x3e3   : > { %1622 = vmatpush3.bf16.msra.mxu1 %v1731_v3 }
 0x3e4   : > { %1556 = vmatmul.mubr.msk.bf16.vlgmr.msra.gmra.mrb[12].mxu0 %vm355_vm3, %v600_v6  ;;  %v835_v11 = vpop.xlane.xlu1 %834 }
 0x3e5   : > { %1566 = vmatpush3.bf16.msra.mxu0 %v726_v7  ;;  %1567 = vmatprep.mubr.msk.bf16.mxu0 %vm1928_vm0, %v1927_v0  ;;  %1756 = vrcp.f32 %v835_v11 }
 0x3e6   : > { %1577 = vmatprep.subr.bf16.mxu0 %v1927_v0 }
 0x3e7   : > { %v1755_v8 = vpop.eup %1754 }
 0x3e8   : > { %v718_v9 = vmul.f32 %v1755_v8, %v2264_v31 }
 0x3ea   : > { %v719_v10 = vpack.c.bf16 %v718_v9, %v718_v9 }
 0x3ec   : > { %1568 = vmatmul.mubr.msk.bf16.vlgmr.msra.gmra.mrb[16].mxu0 %vm355_vm3, %v719_v10 }
 0x3ed   : > { %1579 = vmatprep.mubr.msk.bf16.mxu0 %vm1928_vm0, %v1927_v0 }
 0x3ef   : > { %v1757_v14 = vpop.eup %1756 }
 0x3f0   : > { %v837_v16 = vmul.f32 %v1757_v14, %v2268_v33 }
 0x3f2   : > { %v838_v20 = vpack.c.bf16 %v837_v16, %v837_v16 }
 0x3f4   : > { %v1073_v13 = vpop.xlane.xlu1 %1072 }
 0x409   : > { %v954_v12 = vpop.xlane.xlu0 %953 }
 0x40a   : > { %1758 = vrcp.f32 %v954_v12 }
 0x40b   : > { %1760 = vrcp.f32 %v1073_v13 }
 0x40d   : > { %v959_v19 = vpop.permute.xlu0 %958 }
 0x40e   : > { %v964_v22 = vsel %vm373_vm4, %v959_v19, 0 }
 0x411   : > { %v1078_v24 = vpop.permute.xlu0 %1077 }
 0x412   : > { %v1083_v27 = vsel %vm373_vm4, %v1078_v24, 0 }
 0x414   : > { %v1759_v21 = vpop.eup %1758 }
 0x415   : > { %v956_v23 = vmul.f32 %v1759_v21, %v2280_v45  ;;  %v1761_v26 = vpop.eup %1760  ;;  %v1197_v29 = vpop.permute.xlu0 %1196  ;;  %v1462_v21 = vld [vmem:[%s2394_s3] ss:$0 sm:$0xff] }
 0x416   : > { %v1075_v28 = vmul.f32 %v1761_v26, %v2275_v41  ;;  %v1202_v32 = vsel %vm373_vm4, %v1197_v29, 0 }
 0x417   : > { %v957_v25 = vpack.c.bf16 %v956_v23, %v956_v23 }
 0x418   : > { %v1076_v30 = vpack.c.bf16 %v1075_v28, %v1075_v28 }
 0x421   : > { %v1192_v15 = vpop.xlane.xlu1 %1191 }
 0x422   : > { %1762 = vrcp.f32 %v1192_v15 }
 0x425   : > { %v840_v17 = vpop.permute.xlu1 %839 }
 0x426   : > { %v845_v18 = vsel %vm373_vm4, %v840_v17, 0 }
 0x427   : > { %1578 = vmatpush3.bf16.msra.mxu0 %v845_v18 }
 0x428   : > { %1589 = vmatprep.subr.bf16.mxu0 %v1927_v0 }
 0x42a   : > { %1580 = vmatmul.mubr.msk.bf16.vlgmr.msra.gmra.mrb[20].mxu0 %vm355_vm3, %v838_v20 }
 0x42b   : > { %1590 = vmatpush3.bf16.msra.mxu0 %v964_v22  ;;  %1591 = vmatprep.mubr.msk.bf16.mxu0 %vm1928_vm0, %v1927_v0 }
 0x42c   : > { %1601 = vmatprep.subr.bf16.mxu0 %v1927_v0  ;;  %v1763_v31 = vpop.eup %1762 }
 0x42d   : > { %v1194_v33 = vmul.f32 %v1763_v31, %v2285_v51 }
 0x42f   : > { %v1195_v34 = vpack.c.bf16 %v1194_v33, %v1194_v33 }
 0x432   : > { %1592 = vmatmul.mubr.msk.bf16.vlgmr.msra.gmra.mrb[24].mxu0 %vm355_vm3, %v957_v25 }
 0x433   : > { %1602 = vmatpush3.bf16.msra.mxu0 %v1083_v27  ;;  %1603 = vmatprep.mubr.msk.bf16.mxu0 %vm1928_vm0, %v1927_v0 }
 0x434   : > { %1613 = vmatprep.subr.bf16.mxu0 %v1927_v0 }
 0x43a   : > { %1604 = vmatmul.mubr.msk.bf16.vlgmr.msra.gmra.mrb[28].mxu0 %vm355_vm3, %v1076_v30 }
 0x43b   : > { %1614 = vmatpush3.bf16.msra.mxu0 %v1202_v32  ;;  %1615 = vmatprep.mubr.msk.bf16.mxu0 %vm1928_vm0, %v1927_v0 }
 0x442   : > { %1616 = vmatmul.mubr.msk.bf16.vlgmr.msra.gmra.mrb[32].mxu0 %vm355_vm3, %v1195_v34 }
 0x4a7   : > { %v411_v35 = vpop.f32.mrb[4].mxu0 }
 0x4a8   : > { %v417_v36 = vpack.c.bf16 %v411_v35, %v411_v35  ;;  %v1533_v37 = vpop.f32.mrb[5].mxu0 }
 0x4a9   : > { %v414_v38 = vpop.f32.mrb[6].mxu0 }
 0x4aa   : > { %419 = vst.msk [vmem:[#allocation2] sm:$0xf] %vm418_vm5, %v417_v36  ;;  %v1534_v39 = vpop.f32.mrb[7].mxu0 }
 0x4af   : > { %v524_v40 = vpop.f32.mrb[8].mxu0 }
 0x4b0   : > { %v1470_v41 = vpack.c.bf16 %v524_v40, %v524_v40  ;;  %v1545_v42 = vpop.f32.mrb[9].mxu0 }
 0x4b1   : > { %v527_v43 = vpop.f32.mrb[10].mxu0 }
 0x4b2   : > { %534 = vrot.lane.b32.xlu1 %v1470_v41, %s1952_s10  ;;  %v1546_v44 = vpop.f32.mrb[11].mxu0  ;;  %s1850_s10 = scalar_lea.vmem %s2348_s30, 128 }
 0x4b3   : > { %p1851_p8 = scmp.ne.s32.totalorder %s2348_s30, %s1850_s10 }
 0x4b5   : > { %p1852_p1 = pnand %p1851_p8, %p2409_p0 }
 0x4b7   : > { %v643_v45 = vpop.f32.mrb[12].mxu0  ;;  %p1853_p3 = pneg %p1852_p1 }
 0x4b8   : > { %v1471_v46 = vpack.c.bf16 %v643_v45, %v643_v45  ;;  %v1557_v47 = vpop.f32.mrb[13].mxu0 }
 0x4b9   : > { %v646_v48 = vpop.f32.mrb[14].mxu0 }
 0x4ba   : > { %653 = vrot.lane.b32.xlu0 %v1471_v46, %s1953_s24  ;;  %v1558_v49 = vpop.f32.mrb[15].mxu0  ;;  %s1959_s24 = smov [#allocation9]  }
 0x4bf   : > { %v762_v50 = vpop.f32.mrb[16].mxu0 }
 0x4c0   : > { %v1472_v51 = vpack.c.bf16 %v762_v50, %v762_v50  ;;  %v1569_v52 = vpop.f32.mrb[17].mxu0 }
 0x4c1   : > { %v765_v53 = vpop.f32.mrb[18].mxu0 }
 0x4c2   : > { %772 = vrot.lane.b32.xlu1 %v1472_v51, %s1954_s20  ;;  %v1570_v54 = vpop.f32.mrb[19].mxu0  ;;  %s1854_s20 = sshll.u32 %s1959_s24, 4  ;;  %s1855_s20 = int_to_ptr.vmem [resolvable:$false] %s1854_s20 }
 0x4c3   : > { %p1857_p7 = scmp.lt.s32.totalorder %s2348_s30, %s1855_s20 }
 0x4fd   : > { %v881_v55 = vpop.f32.mrb[20].mxu0 }
 0x4fe   : > { %v1473_v56 = vpack.c.bf16 %v881_v55, %v881_v55  ;;  %v1581_v57 = vpop.f32.mrb[21].mxu0 }
 0x4ff   : > { %v884_v58 = vpop.f32.mrb[22].mxu0 }
 0x500   : > { %891 = vrot.lane.b32.xlu0 %v1473_v56, %s1955_s28  ;;  %v1582_v59 = vpop.f32.mrb[23].mxu0  ;;  %s1856_s28 = scalar_lea.vmem %s1855_s20, 256 }
 0x501   : > { %p1858_p9 = scmp.lt.s32.totalorder %s1856_s28, %s1850_s10 }
 0x503   : > { %p1859_p12 = por %p1858_p9, %p1857_p7 }
 0x505   : > { %v1000_v60 = vpop.f32.mrb[24].mxu0  ;;  %p1860_p2 = pnand %p1859_p12, %p1853_p3 }
 0x506   : > { %v1474_v5 = vpack.c.bf16 %v1000_v60, %v1000_v60  ;;  %v1593_v61 = vpop.f32.mrb[25].mxu0 }
 0x507   : > { %v1003_v62 = vpop.f32.mrb[26].mxu0 }
 0x508   : > { %1010 = vrot.lane.b32.xlu1 %v1474_v5, %s1956_s11  ;;  %v1594_v63 = vpop.f32.mrb[27].mxu0 }
 0x50d   : > { %v1119_v2 = vpop.f32.mrb[28].mxu0 }
 0x50e   : > { %v1475_v4 = vpack.c.bf16 %v1119_v2, %v1119_v2  ;;  %v1605_v6 = vpop.f32.mrb[29].mxu0 }
 0x50f   : > { %v1122_v7 = vpop.f32.mrb[30].mxu0 }
 0x510   : > { %1129 = vrot.lane.b32.xlu0 %v1475_v4, %s1957_s12  ;;  %v1606_v8 = vpop.f32.mrb[31].mxu0 }
 0x515   : > { %v1238_v9 = vpop.f32.mrb[32].mxu0 }
 0x516   : > { %v1476_v10 = vpack.c.bf16 %v1238_v9, %v1238_v9  ;;  %v1617_v11 = vpop.f32.mrb[33].mxu0 }
 0x517   : > { %v1241_v12 = vpop.f32.mrb[34].mxu0 }
 0x518   : > { %1248 = vrot.lane.b32.xlu1 %v1476_v10, %s1958_s25  ;;  %v1618_v13 = vpop.f32.mrb[35].mxu0 }
 0x524   : > { %v535_v14 = vpop.permute.xlu1 %534 }
 0x525   : > { %538 = vst.msk [vmem:[#allocation2] sm:$0xf] %vm537_vm6, %v535_v14 }
 0x52c   : > { %v654_v15 = vpop.permute.xlu0 %653 }
 0x52d   : > { %657 = vst.msk [vmem:[#allocation2] sm:$0xf] %vm656_vm7, %v654_v15 }
 0x534   : > { %v773_v0 = vpop.permute.xlu1 %772 }
 0x535   : > { %776 = vst.msk [vmem:[#allocation2] sm:$0xf] %vm775_vm8, %v773_v0 }
 0x572   : > { %v892_v16 = vpop.permute.xlu0 %891 }
 0x573   : > { %895 = vst.msk [vmem:[#allocation2] sm:$0xf] %vm894_vm9, %v892_v16 }
 0x57a   : > { %v1011_v17 = vpop.permute.xlu1 %1010 }
 0x57b   : > { %1014 = vst.msk [vmem:[#allocation2] sm:$0xf] %vm1013_vm10, %v1011_v17 }
 0x582   : > { %v1130_v18 = vpop.permute.xlu0 %1129 }
 0x583   : > { %1133 = vst.msk [vmem:[#allocation2] sm:$0xf] %vm1132_vm11, %v1130_v18 }
 0x58a   : > { %v1249_v19 = vpop.permute.xlu1 %1248 }
 0x58b   : > { %1252 = vst.msk [vmem:[#allocation2] sm:$0xf] %vm1251_vm12, %v1249_v19 }
 0x592   : > { %v1253_v20 = vld [vmem:[#allocation2] sm:$0xf] }
 0x593   : > { %1624 = vmatmul.mubr.msk.bf16.vlgmr.msra.gmra.mrb[32].mxu1 %vm260_vm1, %v1253_v20 }
 0x666   : > { %v1314_v22 = vpop.f32.mrb[32].mxu1 }
 0x667   : > { %v1315_v23 = vadd.f32 %v1462_v21, %v1314_v22  ;;  %v1625_v24 = vpop.f32.mrb[33].mxu1 }
 0x668   : > { %v1317_v25 = vpop.f32.mrb[34].mxu1 }
 0x669   : > { %v1626_v26 = vpop.f32.mrb[35].mxu1  ;;  %1320 = vst.msk [vmem:[%s241_s27] sm:$0xff] %vm260_vm1, %v1315_v23 }
 0x66a   : > { %1863 = shalt.err (!%p1860_p2)
}
 0x66b   : > { %s1864_s29 = scalar_lea.hbm %s2346_s26, 128  ;;  %s1868_s25 = scalar_lea.hbm %s2395_s4, 256 }
 0x66c   : > { %p1865_p13 = scmp.ne.s32.totalorder %s2346_s26, %s1864_s29  ;;  %p1869_p4 = scmp.lt.u32.totalorder %s2346_s26, %s2395_s4 }
 0x66d   : > { %p1870_p5 = scmp.lt.u32.totalorder %s1868_s25, %s1864_s29  ;;  %p1872_p8 = scmp.lt.u32.totalorder %s1864_s29, %s2346_s26 }
 0x66e   : > { %p1866_p6 = pnand %p1865_p13, %p2409_p0 }
 0x66f   : > { %p1871_p11 = por %p1870_p5, %p1869_p4 }
 0x670   : > { %p1867_p10 = pneg %p1866_p6 }
 0x671   : > { %p1873_p1 = por %p1872_p8, %p1871_p11 }
 0x673   : > { %p1874_p3 = pnand %p1873_p1, %p1867_p10 }
 0x675   : > { %1877 = shalt.err (!%p1874_p3)
}
 0x676   : > { %1637 = dma.vmem_to_hbm [thread:$0]  (%p2409_p0), %s2348_s30, 128, %s2346_s26, %s1322_s19  }
 0x677 PF: > { %s1347_s21 = sand.u32 1, %s1908_s15   ;;  %p2410_p7 = scmp.ne.s32.totalorder %s2400_s22, 0 }
 0x678   : > { %p2411_p9 = scmp.ge.s32.totalorder %s1920_s18, 2  ;;  %s1348_s23 = scalar_lea.sflag [#allocation5], %s1347_s21 }
 0x67a   : > { %p1651_p12 = pnand %p2411_p9, %p2410_p7 }
 0x67c   : > { %1903 = dma.done.wait (!%p1651_p12), %s1348_s23, 128  }
 0x67d   : > { %1905 = vsyncadd (!%p1651_p12), %s1348_s23, 4294967168  ;;  %p18_p2 = scmp.ge.s32.totalorder %s2095_s9, 4   ;;  %s2412_s15 = smov %s1912_s16 }
 0x67e   : > { %s2413_s16 = smov %s1916_s17  ;;  %s2414_s17 = smov %s2111_s14 }
 0x67f   : > { %s2415_s18 = smov %s2095_s9  ;;  %20 = sbr.rel (!%p18_p2) target bundleno = 6 (0x6), region = 89 }
 0x686   :  { %1353 = vsyncpa [#allocation4], 1 }
 0x687   :  { %1355 = vsyncpa [#allocation4 + $0x1], 1 }
 0x688   :  { %1356 = vsyncpa [#allocation7], 1 }
 0x689   :  { %1357 = vsyncpa [#allocation5], 1 }
 0x68a   :  { %1359 = vsyncpa [#allocation5 + $0x1], 1 }

// kernel: tpu_custom_call.1
= control target key start
LH: loop header
LB: loop body
LE: loop exit
PB: predicated region body
PF: predicated region fallthrough
CT: control target
= control target key end

     0   :  { %9 = vsyncpa [#allocation4], 0  ;;  %s2391_s0 = inlined_call_operand.hbm [shape: bf16[2,8,32], index: 0, kind: input, shape index: {}]   ;;  %s2392_s1 = inlined_call_operand.hbm [shape: bf16[32,96], index: 1, kind: input, shape index: {}]   ;;  %s2393_s2 = inlined_call_operand.hbm [shape: bf16[32,32], index: 2, kind: input, shape index: {}]   ;;  %s2394_s3 = inlined_call_operand.vmem [shape: f32[1,32], index: 3, kind: input, shape index: {}]   ;;  %s2395_s4 = inlined_call_operand.hbm [shape: f32[2,8,32], index: 4, kind: output, shape index: {}]  }
   0x1   :  { %11 = vsyncpa [#allocation4 + $0x1], 0 }
   0x2   :  { %12 = vsyncpa [#allocation7], 0 }
   0x3   :  { %13 = vsyncpa [#allocation5], 0 }
   0x4   :  { %15 = vsyncpa [#allocation5 + $0x1], 0  ;;  %s1985_s15 = smov 0   ;;  %s1987_s16 = smov 0  }
   0x5   :  { %s1989_s17 = smov 0   ;;  %s1991_s18 = smov 0  }
   0x6 LB: > { %s2006_s19 = sadd.s32 4294967295, %s1920_s18   ;;  %s1424_s20 = sadd.s32 4294967294, %s1920_s18   ;;  %s1920_s18 = sphi %s1991_s18, %s2415_s18   ;;  %s1916_s17 = sphi %s1989_s17, %s2414_s17   ;;  %s1912_s16 = sphi %s1987_s16, %s2413_s16   ;;  %s1908_s15 = sphi %s1985_s15, %s2412_s15  }
   0x7   : > { %p41_p0 = scmp.ne.s32.totalorder %s1912_s16, %s1908_s15  ;;  %p2396_p1 = scmp.eq.s32.totalorder %s2006_s19, 0 }
   0x8   : > { %p134_p3 = scmp.eq.s32.totalorder %s1424_s20, 1  ;;  %p1425_p5 = scmp.ge.s32.totalorder %s1920_s18, 1 }
   0x9   : > { %p2015_p4 = por %p2396_p1, %p41_p0  ;;  %p141_p7 = scmp.lt.s32.totalorder %s1920_s18, 3 }
   0xa   : > { %p2020_p6 = por %p134_p3, %p41_p0  ;;  %s1922_s24 = smov [#allocation6]  }
   0xb   : > { %s2399_s21 = scalar_select %p2015_p4, 1, 0 }
   0xc   : > { %s2400_s22 = scalar_select %p2020_p6, 1, 0 }
   0xd   : > { %p2025_p8 = pnand %p1425_p5, %p141_p7  ;;  %s153_s25 = sshll.u32 %s1922_s24, 4  ;;  %s2029_s25 = int_to_ptr.vmem [resolvable:$true] %s153_s25 }
   0xe   : > { %s1923_s27 = smov [#allocation8]   ;;  %s1764_s5 = scalar_lea.hbm %s2392_s1, 256 }
   0xf   : > { %p1639_p9 = pneg %p2025_p8  ;;  %s166_s28 = sshll.u32 %s1923_s27, 4  ;;  %s2040_s28 = int_to_ptr.vmem [resolvable:$true] %s166_s28 }
  0x10   : > { %p1765_p12 = scmp.ne.s32.totalorder %s2392_s1, %s1764_s5  ;;  %p1771_p5 = scmp.lt.u32.totalorder %s1764_s5, %s2392_s1 }
  0x11   : > { %p2036_p11 = pnand %p1639_p9, %p2396_p1 }
  0x13   : > { %p1766_p13 = pneg %p2036_p11 }
  0x15   : > { %p1767_p0 = pnand %p1766_p13, %p1765_p12 }
  0x17   : > { %p1768_p3 = pneg %p1767_p0 }
  0x19   : > { %p1773_p7 = pnand %p1771_p5, %p1768_p3 }
  0x1b   : > { %1776 = shalt.err (!%p1773_p7)
}
  0x1c   : > { %s1777_s10 = scalar_lea.vmem %s2029_s25, 256  ;;  %p1785_p2 = scmp.lt.s32.totalorder %s2029_s25, %s2029_s25 }
  0x1d   : > { %p1778_p9 = scmp.ne.s32.totalorder %s2029_s25, %s1777_s10  ;;  %p1786_p12 = scmp.lt.s32.totalorder %s1777_s10, %s1777_s10 }
  0x1f   : > { %p1780_p10 = pnand %p1778_p9, %p1766_p13  ;;  %p1787_p0 = por %p1786_p12, %p1785_p2 }
  0x21   : > { %p1781_p1 = pneg %p1780_p10 }
  0x23   : > { %p1788_p6 = pnand %p1787_p0, %p1781_p1 }
  0x25   : > { %1791 = shalt.err (!%p1788_p6)
}
  0x26   : > { %s1924_s11 = smov 64   ;;  %s1925_s12 = smov 4  }
  0x27   : > { %1642 = dma.hbm_to_vmem [thread:$0]  (!%p2036_p11), %s2392_s1, 256, %s2029_s25, [#allocation7], %s1924_s11, %s1924_s11, %s1925_s12  }
  0x28   : > { %s1792_s27 = scalar_lea.hbm %s2393_s2, 256 }
  0x29   : > { %p1793_p2 = scmp.ne.s32.totalorder %s2393_s2, %s1792_s27  ;;  %p1799_p10 = scmp.lt.u32.totalorder %s1792_s27, %s2393_s2 }
  0x2b   : > { %p1795_p1 = pnand %p1793_p2, %p1766_p13 }
  0x2d   : > { %p1796_p6 = pneg %p1795_p1 }
  0x2f   : > { %p1801_p3 = pnand %p1799_p10, %p1796_p6 }
  0x31   : > { %1804 = shalt.err (!%p1801_p3)
}
  0x32   : > { %s1805_s25 = scalar_lea.vmem %s2040_s28, 256  ;;  %p1813_p12 = scmp.lt.s32.totalorder %s2040_s28, %s2040_s28 }
  0x33   : > { %p1806_p5 = scmp.ne.s32.totalorder %s2040_s28, %s1805_s25  ;;  %p1814_p0 = scmp.lt.s32.totalorder %s1805_s25, %s1805_s25 }
  0x35   : > { %p1808_p7 = pnand %p1806_p5, %p1766_p13  ;;  %p1815_p2 = por %p1814_p0, %p1813_p12 }
  0x37   : > { %p1809_p9 = pneg %p1808_p7 }
  0x39   : > { %p1816_p1 = pnand %p1815_p2, %p1809_p9 }
  0x3b   : > { %1819 = shalt.err (!%p1816_p1)
}
  0x3c   : > { %1645 = dma.hbm_to_vmem [thread:$0]  (!%p2036_p11), %s2393_s2, 256, %s2040_s28, [#allocation7], %s1924_s11, %s1924_s11, %s1925_s12  }
  0x3d   : > { %s2095_s9 = sadd.s32 1, %s1920_s18   ;;  %s28_s26 = sadd.s32 1, %s1916_s17 }
  0x3e   : > { %s25_s10 = ssub.s32 %s1920_s18, %s2095_s9  ;;  %p35_p13 = scmp.ne.s32.totalorder %s1916_s17, %s1912_s16 }
  0x3f   : > { %p26_p6 = scmp.eq.s32.totalorder %s25_s10, 0  ;;  %p36_p10 = scmp.eq.s32.totalorder %s1920_s18, 0 }
  0x40   : > { %p2403_p3 = scmp.eq.s32.totalorder %s2006_s19, 1  ;;  %p1656_p7 = scmp.lt.s32.totalorder %s1920_s18, 2 }
  0x41   : > { %s2111_s14 = scalar_select %p26_p6, %s1916_s17, %s28_s26  }
  0x42   : > { %p2105_p5 = por %p2403_p3, %p35_p13  ;;  %p37_p9 = por %p36_p10, %p35_p13 }
  0x43   : > { %s183_s20 = sand.u32 1, %s1916_s17   ;;  %s1430_s28 = sshll.u32 %s1920_s18, 6 }
  0x44   : > { %s2404_s13 = scalar_select %p2105_p5, 1, 0 }
  0x45   : > { %s1429_s24 = sshll.u32 %s183_s20, 2  ;;  %s2118_s27 = scalar_lea.hbm %s2391_s0, %s1430_s28 }
  0x46   : > { %s187_s29 = scalar_lea.vmem [#allocation3], %s1429_s24  ;;  %p2122_p11 = pnand %p1656_p7, %p37_p9 }
  0x47   : > { %s194_s30 = sshll.u32 %s187_s29, 4  ;;  %s184_s6 = scalar_lea.sflag [#allocation4], %s183_s20  ;;  %s2120_s30 = int_to_ptr.vmem [resolvable:$true] %s194_s30 }
  0x48   : > { %s1820_s25 = scalar_lea.hbm %s2118_s27, 64  ;;  %p1822_p0 = pneg %p2122_p11 }
  0x49   : > { %p1821_p12 = scmp.ne.s32.totalorder %s2118_s27, %s1820_s25  ;;  %s1825_s26 = scalar_lea.hbm %s2391_s0, 128 }
  0x4a   : > { %p1826_p13 = scmp.lt.u32.totalorder %s2118_s27, %s2391_s0  ;;  %p1827_p6 = scmp.lt.u32.totalorder %s1825_s26, %s1820_s25 }
  0x4b   : > { %p1823_p2 = pnand %p1822_p0, %p1821_p12  ;;  %p1829_p3 = scmp.lt.u32.totalorder %s1820_s25, %s2118_s27 }
  0x4c   : > { %p1828_p10 = por %p1827_p6, %p1826_p13 }
  0x4d   : > { %p1824_p1 = pneg %p1823_p2 }
  0x4e   : > { %p1830_p7 = por %p1829_p3, %p1828_p10 }
  0x50   : > { %p1831_p9 = pnand %p1830_p7, %p1824_p1 }
  0x52   : > { %1834 = shalt.err (!%p1831_p9)
}
  0x53   : > { %s1835_s20 = scalar_lea.vmem %s2120_s30, 64  ;;  %s1926_s28 = smov [#allocation3]  }
  0x54   : > { %p1836_p12 = scmp.ne.s32.totalorder %s2120_s30, %s1835_s20  ;;  %s1840_s11 = sshll.u32 %s1926_s28, 4  ;;  %s1841_s11 = int_to_ptr.vmem [resolvable:$false] %s1840_s11 }
  0x55   : > { %s1842_s12 = scalar_lea.vmem %s1841_s11, 128  ;;  %p1843_p4 = scmp.lt.s32.totalorder %s2120_s30, %s1841_s11 }
  0x56   : > { %p1838_p2 = pnand %p1836_p12, %p1822_p0  ;;  %p1844_p13 = scmp.lt.s32.totalorder %s1842_s12, %s1835_s20 }
  0x58   : > { %p1839_p5 = pneg %p1838_p2  ;;  %p1845_p6 = por %p1844_p13, %p1843_p4 }
  0x5a   : > { %p1846_p10 = pnand %p1845_p6, %p1839_p5 }
  0x5c   : > { %1849 = shalt.err (!%p1846_p10)
}
  0x5d   : > { %1649 = dma.hbm_to_vmem [thread:$0]  (!%p2122_p11), %s2118_s27, 64, %s2120_s30, %s184_s6  }
  0x5e   : > { %203 = sbr.rel (%p2025_p8) target bundleno = 1655 (0x677), region = 36  ;;  %s2154_s29 = sand.u32 (!%p2025_p8), 1, %s1912_s16  }
  0x5f   : > { %s1432_s25 = sshll.u32 (!%p2025_p8), %s2154_s29, 2  ;;  %s206_s7 = scalar_lea.sflag (!%p2025_p8), [#allocation4], %s2154_s29 }
  0x60   : > { %s209_s8 = scalar_lea.vmem (!%p2025_p8), [#allocation3], %s1432_s25  ;;  %p2406_p4 = scmp.ne.s32.totalorder (!%p2025_p8), %s2399_s21, 0 }
  0x65   : > { %1895 = dma.done.wait (%p2406_p4), %s206_s7, 64  }
  0x66   : > { %1897 = vsyncadd (%p2406_p4), %s206_s7, 4294967232  ;;  %p2407_p5 = scmp.eq.s32.totalorder %s2006_s19, 0 }
  0x68   : > { %1899 = dma.done.wait (%p2407_p5), [#allocation7], 512   ;;  %p2408_p11 = pmov %p2407_p5 }
  0x69   : > { %v1927_v0 = vmov 0.0   ;;  %vm1928_vm0 = vmmov 0   ;;  %v1728_v1 = vld [vmem:[#allocation6] sm:$0xff]   ;;  %v1729_v2 = vld [vmem:[#allocation6 + $0x8] sm:$0xff]   ;;  %v243_v3 = vld [vmem:[%s209_s8] sm:$0xf] }
  0x6a   : > { %1901 = vsyncadd (%p2408_p11), [#allocation7], 4294966784  ;;  %1515 = vmatprep.subr.bf16.mxu0 %v1927_v0  ;;  %1519 = vmatprep.mubr.msk.bf16.mxu0 %vm1928_vm0, %v1927_v0  ;;  %vm260_vm1 = vcmask 261120   ;;  %s1929_s21 = smov 124   ;;  %s1930_s23 = smov 96   ;;  %vm308_vm2 = vcmask 31744  }
  0x6b   : > { %1523 = vmatprep.subr.bf16.mxu1 %v1927_v0  ;;  %1525 = vmatprep.mubr.msk.bf16.mxu1 %vm1928_vm0, %v1927_v0  ;;  %s1931_s27 = smov 88   ;;  %s1932_s30 = smov 92   ;;  %vm355_vm3 = vcmask 64512   ;;  %vm373_vm4 = vcmask 1043456   ;;  %vm418_vm5 = vcmask 27648   ;;  %vm537_vm6 = vcmask 60448  }
  0x6c   : > { %1516 = vmatpush3.bf16.msra.mxu0 %v1728_v1  ;;  %s1933_s5 = smov 84   ;;  %s1934_s6 = smov 120   ;;  %vm656_vm7 = vcmask 93248   ;;  %vm775_vm8 = vcmask 126048   ;;  %vm894_vm9 = vcmask 158848   ;;  %vm1013_vm10 = vcmask 191648  }
  0x6d   : > { %1517 = vmatprep.subr.bf16.mxu0 %v1927_v0  ;;  %s1935_s26 = smov 80   ;;  %s1936_s10 = smov 116   ;;  %vm1132_vm11 = vcmask 224448   ;;  %vm1251_vm12 = vcmask 257248  }
  0x6e   : > { %s1937_s24 = smov 76   ;;  %s1938_s20 = smov 112  }
  0x6f   : > { %s1939_s28 = smov 72   ;;  %s1940_s11 = smov 108  }
  0x70   : > { %1518 = vmatpush3.bf16.msra.mxu0 %v1729_v2  ;;  %s1941_s12 = smov 68   ;;  %s1942_s25 = smov 104  }
  0x71   : > { %1529 = vmatprep.subr.bf16.mxu0 %v1927_v0  ;;  %s1943_s7 = smov 100   ;;  %s1944_s8 = smov 60  }
  0x72   : > { %p2409_p0 = scmp.ne.s32.totalorder %s2404_s13, 0 }
  0x73   : > { %1520 = vmatmul.mubr.msk.bf16.vlgmr.msra.gmra.mrb[0].mxu0 %vm260_vm1, %v243_v3 }
  0x74   : > { %1531 = vmatprep.mubr.msk.bf16.mxu0 %vm1928_vm0, %v1927_v0 }
 0x146   : > { %v298_v4 = vpop.f32.mrb[0].mxu0 }
 0x147   : > { %v2177_v5 = vpack.c.bf16 %v298_v4, %v298_v4  ;;  %v1521_v6 = vpop.f32.mrb[1].mxu0 }
 0x148   : > { %v301_v7 = vpop.f32.mrb[2].mxu0 }
 0x149   : > { %420 = vrot.lane.b32.xlu1 %v2177_v5, %s1929_s21  ;;  %306 = vrot.lane.b32.xlu0 %v2177_v5, %s1930_s23  ;;  %v1522_v8 = vpop.f32.mrb[3].mxu0  ;;  %s1945_s21 = smov 64   ;;  %s1946_s23 = smov 56  }
 0x14d   : > { %541 = vrot.lane.b32.xlu1 %v2177_v5, %s1931_s27  ;;  %422 = vrot.lane.b32.xlu0 %v2177_v5, %s1932_s30  ;;  %s1947_s27 = smov 52   ;;  %s1948_s30 = smov 44  }
 0x151   : > { %660 = vrot.lane.b32.xlu1 %v2177_v5, %s1933_s5  ;;  %539 = vrot.lane.b32.xlu0 %v2177_v5, %s1934_s6  ;;  %s1949_s5 = smov 40   ;;  %s1950_s6 = smov 36  }
 0x155   : > { %779 = vrot.lane.b32.xlu1 %v2177_v5, %s1935_s26  ;;  %658 = vrot.lane.b32.xlu0 %v2177_v5, %s1936_s10  ;;  %s1951_s26 = smov 48   ;;  %s1952_s10 = smov 4  }
 0x159   : > { %898 = vrot.lane.b32.xlu1 %v2177_v5, %s1937_s24  ;;  %777 = vrot.lane.b32.xlu0 %v2177_v5, %s1938_s20  ;;  %s1953_s24 = smov 8   ;;  %s1954_s20 = smov 12  }
 0x15d   : > { %1017 = vrot.lane.b32.xlu1 %v2177_v5, %s1939_s28  ;;  %896 = vrot.lane.b32.xlu0 %v2177_v5, %s1940_s11  ;;  %s1955_s28 = smov 16   ;;  %s1956_s11 = smov 20  }
 0x161   : > { %1136 = vrot.lane.b32.xlu1 %v2177_v5, %s1941_s12  ;;  %1015 = vrot.lane.b32.xlu0 %v2177_v5, %s1942_s25  ;;  %s1957_s12 = smov 24   ;;  %s1958_s25 = smov 28  }
 0x165   : > { %1134 = vrot.lane.b32.xlu0 %v2177_v5, %s1943_s7  ;;  %s1435_s7 = sshll.u32 %s2154_s29, 3 }
 0x1bb   : > { %v307_v9 = vpop.permute.xlu0 %306  ;;  %v421_v12 = vpop.permute.xlu1 %420 }
 0x1bc   : > { %v313_v10 = vsel %vm308_vm2, %v307_v9, 0 }
 0x1bd   : > { %1524 = vmatpush3.bf16.xpose.msra.mxu1 %v313_v10 }
 0x1be   : > { %1535 = vmatprep.subr.bf16.mxu1 %v1927_v0 }
 0x1bf   : > { %v423_v11 = vpop.permute.xlu0 %422  ;;  %v542_v14 = vpop.permute.xlu1 %541 }
 0x1c0   : > { %v428_v13 = vsel %vm308_vm2, %v423_v11, 0  ;;  %v547_v15 = vsel %vm308_vm2, %v542_v14, 0 }
 0x1c3   : > { %v661_v16 = vpop.permute.xlu1 %660  ;;  %v540_v17 = vpop.permute.xlu0 %539 }
 0x1c4   : > { %1526 = vmatmul.mubr.msk.bf16.vlgmr.msra.gmra.mrb[0].mxu1 %vm308_vm2, %v2177_v5  ;;  %v666_v18 = vsel %vm308_vm2, %v661_v16, 0 }
 0x1c5   : > { %1536 = vmatpush3.bf16.xpose.msra.mxu1 %v428_v13  ;;  %1537 = vmatprep.mubr.msk.bf16.mxu1 %vm1928_vm0, %v1927_v0 }
 0x1c6   : > { %1547 = vmatprep.subr.bf16.mxu1 %v1927_v0 }
 0x1c7   : > { %v780_v19 = vpop.permute.xlu1 %779  ;;  %v659_v20 = vpop.permute.xlu0 %658 }
 0x1c8   : > { %v785_v21 = vsel %vm308_vm2, %v780_v19, 0 }
 0x1cb   : > { %v899_v22 = vpop.permute.xlu1 %898  ;;  %v778_v23 = vpop.permute.xlu0 %777 }
 0x1cc   : > { %1538 = vmatmul.mubr.msk.bf16.vlgmr.msra.gmra.mrb[4].mxu1 %vm308_vm2, %v421_v12  ;;  %v904_v24 = vsel %vm308_vm2, %v899_v22, 0 }
 0x1cd   : > { %1548 = vmatpush3.bf16.xpose.msra.mxu1 %v547_v15  ;;  %1549 = vmatprep.mubr.msk.bf16.mxu1 %vm1928_vm0, %v1927_v0 }
 0x1ce   : > { %1559 = vmatprep.subr.bf16.mxu1 %v1927_v0 }
 0x1cf   : > { %v1018_v25 = vpop.permute.xlu1 %1017  ;;  %v897_v26 = vpop.permute.xlu0 %896 }
 0x1d0   : > { %v1023_v27 = vsel %vm308_vm2, %v1018_v25, 0 }
 0x1d3   : > { %v1137_v28 = vpop.permute.xlu1 %1136  ;;  %v1016_v29 = vpop.permute.xlu0 %1015 }
 0x1d4   : > { %1550 = vmatmul.mubr.msk.bf16.vlgmr.msra.gmra.mrb[8].mxu1 %vm308_vm2, %v540_v17  ;;  %v1142_v30 = vsel %vm308_vm2, %v1137_v28, 0 }
 0x1d5   : > { %1560 = vmatpush3.bf16.xpose.msra.mxu1 %v666_v18  ;;  %1561 = vmatprep.mubr.msk.bf16.mxu1 %vm1928_vm0, %v1927_v0 }
 0x1d6   : > { %1571 = vmatprep.subr.bf16.mxu1 %v1927_v0 }
 0x1d7   : > { %v1135_v31 = vpop.permute.xlu0 %1134 }
 0x1dc   : > { %1562 = vmatmul.mubr.msk.bf16.vlgmr.msra.gmra.mrb[12].mxu1 %vm308_vm2, %v659_v20 }
 0x1dd   : > { %1572 = vmatpush3.bf16.xpose.msra.mxu1 %v785_v21  ;;  %1573 = vmatprep.mubr.msk.bf16.mxu1 %vm1928_vm0, %v1927_v0 }
 0x1de   : > { %1583 = vmatprep.subr.bf16.mxu1 %v1927_v0 }
 0x1e4   : > { %1574 = vmatmul.mubr.msk.bf16.vlgmr.msra.gmra.mrb[16].mxu1 %vm308_vm2, %v778_v23 }
 0x1e5   : > { %1584 = vmatpush3.bf16.xpose.msra.mxu1 %v904_v24  ;;  %1585 = vmatprep.mubr.msk.bf16.mxu1 %vm1928_vm0, %v1927_v0 }
 0x1e6   : > { %1595 = vmatprep.subr.bf16.mxu1 %v1927_v0 }
 0x1ec   : > { %1586 = vmatmul.mubr.msk.bf16.vlgmr.msra.gmra.mrb[20].mxu1 %vm308_vm2, %v897_v26 }
 0x1ed   : > { %1596 = vmatpush3.bf16.xpose.msra.mxu1 %v1023_v27  ;;  %1597 = vmatprep.mubr.msk.bf16.mxu1 %vm1928_vm0, %v1927_v0 }
 0x1ee   : > { %1607 = vmatprep.subr.bf16.mxu1 %v1927_v0 }
 0x1f4   : > { %1598 = vmatmul.mubr.msk.bf16.vlgmr.msra.gmra.mrb[24].mxu1 %vm308_vm2, %v1016_v29 }
 0x1f5   : > { %1608 = vmatpush3.bf16.xpose.msra.mxu1 %v1142_v30  ;;  %1609 = vmatprep.mubr.msk.bf16.mxu1 %vm1928_vm0, %v1927_v0 }
 0x1f6   : > { %1619 = vmatprep.subr.bf16.mxu1 %v1927_v0 }
 0x1fc   : > { %1610 = vmatmul.mubr.msk.bf16.vlgmr.msra.gmra.mrb[28].mxu1 %vm308_vm2, %v1135_v31 }
 0x1fd   : > { %1623 = vmatprep.mubr.msk.bf16.mxu1 %vm1928_vm0, %v1927_v0 }
 0x297   : > { %v349_v32 = vpop.f32.mrb[0].mxu1 }
 0x298   : > { %v1527_v33 = vpop.f32.mrb[1].mxu1  ;;  %v356_v34 = vsel %vm355_vm3, %v349_v32, -inf }
 0x299   : > { %357 = vmax.xlane.f32.xlu1 %v356_v34  ;;  %v352_v35 = vpop.f32.mrb[2].mxu1 }
 0x29a   : > { %v1528_v36 = vpop.f32.mrb[3].mxu1 }
 0x29f   : > { %v464_v37 = vpop.f32.mrb[4].mxu1 }
 0x2a0   : > { %v1539_v38 = vpop.f32.mrb[5].mxu1  ;;  %v470_v39 = vsel %vm355_vm3, %v464_v37, -inf }
 0x2a1   : > { %471 = vmax.xlane.f32.xlu0 %v470_v39  ;;  %v467_v40 = vpop.f32.mrb[6].mxu1 }
 0x2a2   : > { %v1540_v41 = vpop.f32.mrb[7].mxu1 }
 0x2a7   : > { %v583_v42 = vpop.f32.mrb[8].mxu1 }
 0x2a8   : > { %v1551_v43 = vpop.f32.mrb[9].mxu1  ;;  %v589_v44 = vsel %vm355_vm3, %v583_v42, -inf }
 0x2a9   : > { %590 = vmax.xlane.f32.xlu0 %v589_v44  ;;  %v586_v45 = vpop.f32.mrb[10].mxu1 }
 0x2aa   : > { %v1552_v46 = vpop.f32.mrb[11].mxu1 }
 0x2af   : > { %v702_v47 = vpop.f32.mrb[12].mxu1 }
 0x2b0   : > { %v1563_v48 = vpop.f32.mrb[13].mxu1  ;;  %v708_v49 = vsel %vm355_vm3, %v702_v47, -inf }
 0x2b1   : > { %709 = vmax.xlane.f32.xlu1 %v708_v49  ;;  %v705_v50 = vpop.f32.mrb[14].mxu1 }
 0x2b2   : > { %v1564_v51 = vpop.f32.mrb[15].mxu1 }
 0x2b7   : > { %v821_v52 = vpop.f32.mrb[16].mxu1 }
 0x2b8   : > { %v1575_v53 = vpop.f32.mrb[17].mxu1  ;;  %v827_v54 = vsel %vm355_vm3, %v821_v52, -inf }
 0x2b9   : > { %828 = vmax.xlane.f32.xlu0 %v827_v54  ;;  %v824_v55 = vpop.f32.mrb[18].mxu1 }
 0x2ba   : > { %v1576_v56 = vpop.f32.mrb[19].mxu1 }
 0x2bf   : > { %v2240_v57 = vpop.f32.mrb[20].mxu1 }
 0x2c0   : > { %v1587_v58 = vpop.f32.mrb[21].mxu1  ;;  %v946_v59 = vsel %vm355_vm3, %v2240_v57, -inf }
 0x2c1   : > { %947 = vmax.xlane.f32.xlu1 %v946_v59  ;;  %v943_v60 = vpop.f32.mrb[22].mxu1 }
 0x2c2   : > { %v1588_v61 = vpop.f32.mrb[23].mxu1 }
 0x2c7   : > { %v1059_v62 = vpop.f32.mrb[24].mxu1 }
 0x2c8   : > { %v1599_v63 = vpop.f32.mrb[25].mxu1  ;;  %v1065_v1 = vsel %vm355_vm3, %v1059_v62, -inf }
 0x2c9   : > { %1066 = vmax.xlane.f32.xlu0 %v1065_v1  ;;  %v1062_v2 = vpop.f32.mrb[26].mxu1 }
 0x2ca   : > { %v1600_v3 = vpop.f32.mrb[27].mxu1 }
 0x2cf   : > { %v2245_v4 = vpop.f32.mrb[28].mxu1 }
 0x2d0   : > { %v1611_v6 = vpop.f32.mrb[29].mxu1  ;;  %v1184_v9 = vsel %vm355_vm3, %v2245_v4, -inf }
 0x2d1   : > { %v1181_v7 = vpop.f32.mrb[30].mxu1 }
 0x2d2   : > { %482 = vrot.lane.b32.xlu1 %v2177_v5, %s1944_s8  ;;  %v1612_v8 = vpop.f32.mrb[31].mxu1 }
 0x2df   : > { %368 = vrot.lane.b32.xlu0 %v2177_v5, %s1945_s21 }
 0x2f6   : > { %1185 = vmax.xlane.f32.xlu1 %v1184_v9 }
 0x307   : > { %601 = vrot.lane.b32.xlu1 %v2177_v5, %s1946_s23  ;;  %s1467_s23 = sshll.u32 %s2006_s19, 7  ;;  %s1322_s19 = scalar_lea.sflag [#allocation5], %s2154_s29 }
 0x326   : > { %v358_v10 = vpop.xlane.xlu1 %357 }
 0x327   : > { %v359_v11 = vsub.f32 %v349_v32, %v358_v10 }
 0x329   : > { %v360_v12 = vmul.f32 1.442695, %v359_v11 }
 0x32b   : > { %1732 = vpow2.f32 %v360_v12 }
 0x32e   : > { %v472_v13 = vpop.xlane.xlu0 %471 }
 0x32f   : > { %v473_v14 = vsub.f32 %v464_v37, %v472_v13 }
 0x331   : > { %v474_v15 = vmul.f32 1.442695, %v473_v14 }
 0x333   : > { %1734 = vpow2.f32 %v474_v15 }
 0x335   : > { %v2252_v16 = vpop.eup %1732 }
 0x336   : > { %v591_v17 = vpop.xlane.xlu0 %590  ;;  %v362_v18 = vsel %vm355_vm3, %v2252_v16, 0.0 }
 0x337   : > { %v592_v19 = vsub.f32 %v583_v42, %v591_v17  ;;  %363 = vadd.xlane.f32.xlu0 %v362_v18 }
 0x339   : > { %v593_v20 = vmul.f32 1.442695, %v592_v19 }
 0x33b   : > { %1736 = vpow2.f32 %v593_v20 }
 0x33d   : > { %v2256_v21 = vpop.eup %1734 }
 0x33e   : > { %v710_v22 = vpop.xlane.xlu1 %709  ;;  %v476_v23 = vsel %vm355_vm3, %v2256_v21, 0.0 }
 0x33f   : > { %v711_v24 = vsub.f32 %v702_v47, %v710_v22  ;;  %477 = vadd.xlane.f32.xlu1 %v476_v23 }
 0x341   : > { %v712_v25 = vmul.f32 1.442695, %v711_v24 }
 0x343   : > { %1738 = vpow2.f32 %v712_v25 }
 0x345   : > { %v2260_v26 = vpop.eup %1736 }
 0x346   : > { %v829_v27 = vpop.xlane.xlu0 %828  ;;  %v595_v28 = vsel %vm355_vm3, %v2260_v26, 0.0 }
 0x347   : > { %v830_v29 = vsub.f32 %v821_v52, %v829_v27  ;;  %596 = vadd.xlane.f32.xlu0 %v595_v28 }
 0x349   : > { %v831_v30 = vmul.f32 1.442695, %v830_v29 }
 0x34b   : > { %1740 = vpow2.f32 %v831_v30 }
 0x34d   : > { %v2264_v31 = vpop.eup %1738 }
 0x34e   : > { %v714_v32 = vsel %vm355_vm3, %v2264_v31, 0.0  ;;  %v948_v40 = vpop.xlane.xlu1 %947 }
 0x34f   : > { %715 = vadd.xlane.f32.xlu1 %v714_v32  ;;  %v949_v42 = vsub.f32 %v2240_v57, %v948_v40 }
 0x351   : > { %v950_v44 = vmul.f32 1.442695, %v949_v42 }
 0x352   : > { %v483_v47 = vpop.permute.xlu1 %482 }
 0x353   : > { %v488_v59 = vsel %vm373_vm4, %v483_v47, 0 }
 0x355   : > { %v2268_v33 = vpop.eup %1740 }
 0x356   : > { %v1067_v34 = vpop.xlane.xlu0 %1066  ;;  %v833_v35 = vsel %vm355_vm3, %v2268_v33, 0.0 }
 0x357   : > { %v1068_v36 = vsub.f32 %v1059_v62, %v1067_v34  ;;  %834 = vadd.xlane.f32.xlu1 %v833_v35 }
 0x359   : > { %v1069_v37 = vmul.f32 1.442695, %v1068_v36 }
 0x35a   : > { %v369_v38 = vpop.permute.xlu0 %368 }
 0x35b   : > { %1742 = vpow2.f32 %v1069_v37  ;;  %v375_v39 = vsel %vm373_vm4, %v369_v38, 0 }
 0x35c   : > { %1530 = vmatpush3.bf16.msra.mxu0 %v375_v39  ;;  %1744 = vpow2.f32 %v950_v44 }
 0x35d   : > { %720 = vrot.lane.b32.xlu0 %v2177_v5, %s1947_s27  ;;  %1541 = vmatprep.subr.bf16.mxu0 %v1927_v0  ;;  %s241_s27 = scalar_lea.vmem [#allocation9], %s1435_s7 }
 0x365   : > { %v2275_v41 = vpop.eup %1742 }
 0x366   : > { %v1071_v43 = vsel %vm355_vm3, %v2275_v41, 0.0  ;;  %v2280_v45 = vpop.eup %1744 }
 0x367   : > { %1072 = vadd.xlane.f32.xlu1 %v1071_v43  ;;  %v952_v46 = vsel %vm355_vm3, %v2280_v45, 0.0 }
 0x37c   : > { %953 = vadd.xlane.f32.xlu0 %v952_v46 }
 0x383   : > { %v1186_v48 = vpop.xlane.xlu1 %1185 }
 0x384   : > { %v1187_v49 = vsub.f32 %v2245_v4, %v1186_v48 }
 0x386   : > { %v1188_v50 = vmul.f32 1.442695, %v1187_v49 }
 0x387   : > { %v602_v54 = vpop.permute.xlu1 %601 }
 0x388   : > { %1746 = vpow2.f32 %v1188_v50  ;;  %v607_v63 = vsel %vm373_vm4, %v602_v54, 0 }
 0x392   : > { %v2285_v51 = vpop.eup %1746  ;;  %958 = vrot.lane.b32.xlu0 %v2177_v5, %s1948_s30  ;;  %s1335_s30 = sshll.u32 %s241_s27, 4  ;;  %s2348_s30 = int_to_ptr.vmem [resolvable:$true] %s1335_s30 }
 0x393   : > { %v1190_v52 = vsel %vm355_vm3, %v2285_v51, 0.0 }
 0x394   : > { %1191 = vadd.xlane.f32.xlu1 %v1190_v52 }
 0x396   : > { %1077 = vrot.lane.b32.xlu0 %v2177_v5, %s1949_s5 }
 0x39a   : > { %1196 = vrot.lane.b32.xlu0 %v2177_v5, %s1950_s6 }
 0x3a5   : > { %839 = vrot.lane.b32.xlu1 %v2177_v5, %s1951_s26  ;;  %s2346_s26 = scalar_lea.hbm %s2395_s4, %s1467_s23 }
 0x3c4   : > { %v364_v53 = vpop.xlane.xlu0 %363 }
 0x3c5   : > { %1748 = vrcp.f32 %v364_v53 }
 0x3cc   : > { %v478_v55 = vpop.xlane.xlu1 %477 }
 0x3cd   : > { %1750 = vrcp.f32 %v478_v55 }
 0x3cf   : > { %v1749_v56 = vpop.eup %1748 }
 0x3d0   : > { %v366_v57 = vmul.f32 %v1749_v56, %v2252_v16 }
 0x3d2   : > { %v367_v58 = vpack.c.bf16 %v366_v57, %v366_v57 }
 0x3d4   : > { %1532 = vmatmul.mubr.msk.bf16.vlgmr.msra.gmra.mrb[4].mxu0 %vm355_vm3, %v367_v58  ;;  %v597_v60 = vpop.xlane.xlu0 %596 }
 0x3d5   : > { %1542 = vmatpush3.bf16.msra.mxu0 %v488_v59  ;;  %1752 = vrcp.f32 %v597_v60  ;;  %1543 = vmatprep.mubr.msk.bf16.mxu0 %vm1928_vm0, %v1927_v0 }
 0x3d6   : > { %1553 = vmatprep.subr.bf16.mxu0 %v1927_v0 }
 0x3d7   : > { %v1751_v5 = vpop.eup %1750 }
 0x3d8   : > { %v480_v61 = vmul.f32 %v1751_v5, %v2256_v21  ;;  %v721_v4 = vpop.permute.xlu0 %720 }
 0x3d9   : > { %v726_v7 = vsel %vm373_vm4, %v721_v4, 0 }
 0x3da   : > { %v481_v62 = vpack.c.bf16 %v480_v61, %v480_v61 }
 0x3dc   : > { %v716_v1 = vpop.xlane.xlu1 %715  ;;  %1544 = vmatmul.mubr.msk.bf16.vlgmr.msra.gmra.mrb[8].mxu0 %vm355_vm3, %v481_v62 }
 0x3dd   : > { %1754 = vrcp.f32 %v716_v1  ;;  %1554 = vmatpush3.bf16.msra.mxu0 %v607_v63  ;;  %1555 = vmatprep.mubr.msk.bf16.mxu0 %vm1928_vm0, %v1927_v0  ;;  %v1730_v1 = vld [vmem:[#allocation8] sm:$0xff]  }
 0x3de   : > { %1565 = vmatprep.subr.bf16.mxu0 %v1927_v0  ;;  %1620 = vmatpush3.bf16.msra.mxu1 %v1730_v1 }
 0x3df   : > { %v1753_v2 = vpop.eup %1752  ;;  %1621 = vmatprep.subr.bf16.mxu1 %v1927_v0 }
 0x3e0   : > { %v599_v3 = vmul.f32 %v1753_v2, %v2260_v26 }
 0x3e2   : > { %v600_v6 = vpack.c.bf16 %v599_v3, %v599_v3  ;;  %v1731_v3 = vld [vmem:[#allocation8 + $0x8] sm:$0xff]  }
 0x3e3   : > { %1622 = vmatpush3.bf16.msra.mxu1 %v1731_v3 }
 0x3e4   : > { %1556 = vmatmul.mubr.msk.bf16.vlgmr.msra.gmra.mrb[12].mxu0 %vm355_vm3, %v600_v6  ;;  %v835_v11 = vpop.xlane.xlu1 %834 }
 0x3e5   : > { %1566 = vmatpush3.bf16.msra.mxu0 %v726_v7  ;;  %1567 = vmatprep.mubr.msk.bf16.mxu0 %vm1928_vm0, %v1927_v0  ;;  %1756 = vrcp.f32 %v835_v11 }
 0x3e6   : > { %1577 = vmatprep.subr.bf16.mxu0 %v1927_v0 }
 0x3e7   : > { %v1755_v8 = vpop.eup %1754 }
 0x3e8   : > { %v718_v9 = vmul.f32 %v1755_v8, %v2264_v31 }
 0x3ea   : > { %v719_v10 = vpack.c.bf16 %v718_v9, %v718_v9 }
 0x3ec   : > { %1568 = vmatmul.mubr.msk.bf16.vlgmr.msra.gmra.mrb[16].mxu0 %vm355_vm3, %v719_v10 }
 0x3ed   : > { %1579 = vmatprep.mubr.msk.bf16.mxu0 %vm1928_vm0, %v1927_v0 }
 0x3ef   : > { %v1757_v14 = vpop.eup %1756 }
 0x3f0   : > { %v837_v16 = vmul.f32 %v1757_v14, %v2268_v33 }
 0x3f2   : > { %v838_v20 = vpack.c.bf16 %v837_v16, %v837_v16 }
 0x3f4   : > { %v1073_v13 = vpop.xlane.xlu1 %1072 }
 0x409   : > { %v954_v12 = vpop.xlane.xlu0 %953 }
 0x40a   : > { %1758 = vrcp.f32 %v954_v12 }
 0x40b   : > { %1760 = vrcp.f32 %v1073_v13 }
 0x40d   : > { %v959_v19 = vpop.permute.xlu0 %958 }
 0x40e   : > { %v964_v22 = vsel %vm373_vm4, %v959_v19, 0 }
 0x411   : > { %v1078_v24 = vpop.permute.xlu0 %1077 }
 0x412   : > { %v1083_v27 = vsel %vm373_vm4, %v1078_v24, 0 }
 0x414   : > { %v1759_v21 = vpop.eup %1758 }
 0x415   : > { %v956_v23 = vmul.f32 %v1759_v21, %v2280_v45  ;;  %v1761_v26 = vpop.eup %1760  ;;  %v1197_v29 = vpop.permute.xlu0 %1196  ;;  %v1462_v21 = vld [vmem:[%s2394_s3] ss:$0 sm:$0xff] }
 0x416   : > { %v1075_v28 = vmul.f32 %v1761_v26, %v2275_v41  ;;  %v1202_v32 = vsel %vm373_vm4, %v1197_v29, 0 }
 0x417   : > { %v957_v25 = vpack.c.bf16 %v956_v23, %v956_v23 }
 0x418   : > { %v1076_v30 = vpack.c.bf16 %v1075_v28, %v1075_v28 }
 0x421   : > { %v1192_v15 = vpop.xlane.xlu1 %1191 }
 0x422   : > { %1762 = vrcp.f32 %v1192_v15 }
 0x425   : > { %v840_v17 = vpop.permute.xlu1 %839 }
 0x426   : > { %v845_v18 = vsel %vm373_vm4, %v840_v17, 0 }
 0x427   : > { %1578 = vmatpush3.bf16.msra.mxu0 %v845_v18 }
 0x428   : > { %1589 = vmatprep.subr.bf16.mxu0 %v1927_v0 }
 0x42a   : > { %1580 = vmatmul.mubr.msk.bf16.vlgmr.msra.gmra.mrb[20].mxu0 %vm355_vm3, %v838_v20 }
 0x42b   : > { %1590 = vmatpush3.bf16.msra.mxu0 %v964_v22  ;;  %1591 = vmatprep.mubr.msk.bf16.mxu0 %vm1928_vm0, %v1927_v0 }
 0x42c   : > { %1601 = vmatprep.subr.bf16.mxu0 %v1927_v0  ;;  %v1763_v31 = vpop.eup %1762 }
 0x42d   : > { %v1194_v33 = vmul.f32 %v1763_v31, %v2285_v51 }
 0x42f   : > { %v1195_v34 = vpack.c.bf16 %v1194_v33, %v1194_v33 }
 0x432   : > { %1592 = vmatmul.mubr.msk.bf16.vlgmr.msra.gmra.mrb[24].mxu0 %vm355_vm3, %v957_v25 }
 0x433   : > { %1602 = vmatpush3.bf16.msra.mxu0 %v1083_v27  ;;  %1603 = vmatprep.mubr.msk.bf16.mxu0 %vm1928_vm0, %v1927_v0 }
 0x434   : > { %1613 = vmatprep.subr.bf16.mxu0 %v1927_v0 }
 0x43a   : > { %1604 = vmatmul.mubr.msk.bf16.vlgmr.msra.gmra.mrb[28].mxu0 %vm355_vm3, %v1076_v30 }
 0x43b   : > { %1614 = vmatpush3.bf16.msra.mxu0 %v1202_v32  ;;  %1615 = vmatprep.mubr.msk.bf16.mxu0 %vm1928_vm0, %v1927_v0 }
 0x442   : > { %1616 = vmatmul.mubr.msk.bf16.vlgmr.msra.gmra.mrb[32].mxu0 %vm355_vm3, %v1195_v34 }
 0x4a7   : > { %v411_v35 = vpop.f32.mrb[4].mxu0 }
 0x4a8   : > { %v417_v36 = vpack.c.bf16 %v411_v35, %v411_v35  ;;  %v1533_v37 = vpop.f32.mrb[5].mxu0 }
 0x4a9   : > { %v414_v38 = vpop.f32.mrb[6].mxu0 }
 0x4aa   : > { %419 = vst.msk [vmem:[#allocation2] sm:$0xf] %vm418_vm5, %v417_v36  ;;  %v1534_v39 = vpop.f32.mrb[7].mxu0 }
 0x4af   : > { %v524_v40 = vpop.f32.mrb[8].mxu0 }
 0x4b0   : > { %v1470_v41 = vpack.c.bf16 %v524_v40, %v524_v40  ;;  %v1545_v42 = vpop.f32.mrb[9].mxu0 }
 0x4b1   : > { %v527_v43 = vpop.f32.mrb[10].mxu0 }
 0x4b2   : > { %534 = vrot.lane.b32.xlu1 %v1470_v41, %s1952_s10  ;;  %v1546_v44 = vpop.f32.mrb[11].mxu0  ;;  %s1850_s10 = scalar_lea.vmem %s2348_s30, 128 }
 0x4b3   : > { %p1851_p8 = scmp.ne.s32.totalorder %s2348_s30, %s1850_s10 }
 0x4b5   : > { %p1852_p1 = pnand %p1851_p8, %p2409_p0 }
 0x4b7   : > { %v643_v45 = vpop.f32.mrb[12].mxu0  ;;  %p1853_p3 = pneg %p1852_p1 }
 0x4b8   : > { %v1471_v46 = vpack.c.bf16 %v643_v45, %v643_v45  ;;  %v1557_v47 = vpop.f32.mrb[13].mxu0 }
 0x4b9   : > { %v646_v48 = vpop.f32.mrb[14].mxu0 }
 0x4ba   : > { %653 = vrot.lane.b32.xlu0 %v1471_v46, %s1953_s24  ;;  %v1558_v49 = vpop.f32.mrb[15].mxu0  ;;  %s1959_s24 = smov [#allocation9]  }
 0x4bf   : > { %v762_v50 = vpop.f32.mrb[16].mxu0 }
 0x4c0   : > { %v1472_v51 = vpack.c.bf16 %v762_v50, %v762_v50  ;;  %v1569_v52 = vpop.f32.mrb[17].mxu0 }
 0x4c1   : > { %v765_v53 = vpop.f32.mrb[18].mxu0 }
 0x4c2   : > { %772 = vrot.lane.b32.xlu1 %v1472_v51, %s1954_s20  ;;  %v1570_v54 = vpop.f32.mrb[19].mxu0  ;;  %s1854_s20 = sshll.u32 %s1959_s24, 4  ;;  %s1855_s20 = int_to_ptr.vmem [resolvable:$false] %s1854_s20 }
 0x4c3   : > { %p1857_p7 = scmp.lt.s32.totalorder %s2348_s30, %s1855_s20 }
 0x4fd   : > { %v881_v55 = vpop.f32.mrb[20].mxu0 }
 0x4fe   : > { %v1473_v56 = vpack.c.bf16 %v881_v55, %v881_v55  ;;  %v1581_v57 = vpop.f32.mrb[21].mxu0 }
 0x4ff   : > { %v884_v58 = vpop.f32.mrb[22].mxu0 }
 0x500   : > { %891 = vrot.lane.b32.xlu0 %v1473_v56, %s1955_s28  ;;  %v1582_v59 = vpop.f32.mrb[23].mxu0  ;;  %s1856_s28 = scalar_lea.vmem %s1855_s20, 256 }
 0x501   : > { %p1858_p9 = scmp.lt.s32.totalorder %s1856_s28, %s1850_s10 }
 0x503   : > { %p1859_p12 = por %p1858_p9, %p1857_p7 }
 0x505   : > { %v1000_v60 = vpop.f32.mrb[24].mxu0  ;;  %p1860_p2 = pnand %p1859_p12, %p1853_p3 }
 0x506   : > { %v1474_v5 = vpack.c.bf16 %v1000_v60, %v1000_v60  ;;  %v1593_v61 = vpop.f32.mrb[25].mxu0 }
 0x507   : > { %v1003_v62 = vpop.f32.mrb[26].mxu0 }
 0x508   : > { %1010 = vrot.lane.b32.xlu1 %v1474_v5, %s1956_s11  ;;  %v1594_v63 = vpop.f32.mrb[27].mxu0 }
 0x50d   : > { %v1119_v2 = vpop.f32.mrb[28].mxu0 }
 0x50e   : > { %v1475_v4 = vpack.c.bf16 %v1119_v2, %v1119_v2  ;;  %v1605_v6 = vpop.f32.mrb[29].mxu0 }
 0x50f   : > { %v1122_v7 = vpop.f32.mrb[30].mxu0 }
 0x510   : > { %1129 = vrot.lane.b32.xlu0 %v1475_v4, %s1957_s12  ;;  %v1606_v8 = vpop.f32.mrb[31].mxu0 }
 0x515   : > { %v1238_v9 = vpop.f32.mrb[32].mxu0 }
 0x516   : > { %v1476_v10 = vpack.c.bf16 %v1238_v9, %v1238_v9  ;;  %v1617_v11 = vpop.f32.mrb[33].mxu0 }
 0x517   : > { %v1241_v12 = vpop.f32.mrb[34].mxu0 }
 0x518   : > { %1248 = vrot.lane.b32.xlu1 %v1476_v10, %s1958_s25  ;;  %v1618_v13 = vpop.f32.mrb[35].mxu0 }
 0x524   : > { %v535_v14 = vpop.permute.xlu1 %534 }
 0x525   : > { %538 = vst.msk [vmem:[#allocation2] sm:$0xf] %vm537_vm6, %v535_v14 }
 0x52c   : > { %v654_v15 = vpop.permute.xlu0 %653 }
 0x52d   : > { %657 = vst.msk [vmem:[#allocation2] sm:$0xf] %vm656_vm7, %v654_v15 }
 0x534   : > { %v773_v0 = vpop.permute.xlu1 %772 }
 0x535   : > { %776 = vst.msk [vmem:[#allocation2] sm:$0xf] %vm775_vm8, %v773_v0 }
 0x572   : > { %v892_v16 = vpop.permute.xlu0 %891 }
 0x573   : > { %895 = vst.msk [vmem:[#allocation2] sm:$0xf] %vm894_vm9, %v892_v16 }
 0x57a   : > { %v1011_v17 = vpop.permute.xlu1 %1010 }
 0x57b   : > { %1014 = vst.msk [vmem:[#allocation2] sm:$0xf] %vm1013_vm10, %v1011_v17 }
 0x582   : > { %v1130_v18 = vpop.permute.xlu0 %1129 }
 0x583   : > { %1133 = vst.msk [vmem:[#allocation2] sm:$0xf] %vm1132_vm11, %v1130_v18 }
 0x58a   : > { %v1249_v19 = vpop.permute.xlu1 %1248 }
 0x58b   : > { %1252 = vst.msk [vmem:[#allocation2] sm:$0xf] %vm1251_vm12, %v1249_v19 }
 0x592   : > { %v1253_v20 = vld [vmem:[#allocation2] sm:$0xf] }
 0x593   : > { %1624 = vmatmul.mubr.msk.bf16.vlgmr.msra.gmra.mrb[32].mxu1 %vm260_vm1, %v1253_v20 }
 0x666   : > { %v1314_v22 = vpop.f32.mrb[32].mxu1 }
 0x667   : > { %v1315_v23 = vadd.f32 %v1462_v21, %v1314_v22  ;;  %v1625_v24 = vpop.f32.mrb[33].mxu1 }
 0x668   : > { %v1317_v25 = vpop.f32.mrb[34].mxu1 }
 0x669   : > { %v1626_v26 = vpop.f32.mrb[35].mxu1  ;;  %1320 = vst.msk [vmem:[%s241_s27] sm:$0xff] %vm260_vm1, %v1315_v23 }
 0x66a   : > { %1863 = shalt.err (!%p1860_p2)
}
 0x66b   : > { %s1864_s29 = scalar_lea.hbm %s2346_s26, 128  ;;  %s1868_s25 = scalar_lea.hbm %s2395_s4, 256 }
 0x66c   : > { %p1865_p13 = scmp.ne.s32.totalorder %s2346_s26, %s1864_s29  ;;  %p1869_p4 = scmp.lt.u32.totalorder %s2346_s26, %s2395_s4 }
 0x66d   : > { %p1870_p5 = scmp.lt.u32.totalorder %s1868_s25, %s1864_s29  ;;  %p1872_p8 = scmp.lt.u32.totalorder %s1864_s29, %s2346_s26 }
 0x66e   : > { %p1866_p6 = pnand %p1865_p13, %p2409_p0 }
 0x66f   : > { %p1871_p11 = por %p1870_p5, %p1869_p4 }
 0x670   : > { %p1867_p10 = pneg %p1866_p6 }
 0x671   : > { %p1873_p1 = por %p1872_p8, %p1871_p11 }
 0x673   : > { %p1874_p3 = pnand %p1873_p1, %p1867_p10 }
 0x675   : > { %1877 = shalt.err (!%p1874_p3)
}
 0x676   : > { %1637 = dma.vmem_to_hbm [thread:$0]  (%p2409_p0), %s2348_s30, 128, %s2346_s26, %s1322_s19  }
 0x677 PF: > { %s1347_s21 = sand.u32 1, %s1908_s15   ;;  %p2410_p7 = scmp.ne.s32.totalorder %s2400_s22, 0 }
 0x678   : > { %p2411_p9 = scmp.ge.s32.totalorder %s1920_s18, 2  ;;  %s1348_s23 = scalar_lea.sflag [#allocation5], %s1347_s21 }
 0x67a   : > { %p1651_p12 = pnand %p2411_p9, %p2410_p7 }
 0x67c   : > { %1903 = dma.done.wait (!%p1651_p12), %s1348_s23, 128  }
 0x67d   : > { %1905 = vsyncadd (!%p1651_p12), %s1348_s23, 4294967168  ;;  %p18_p2 = scmp.ge.s32.totalorder %s2095_s9, 4   ;;  %s2412_s15 = smov %s1912_s16 }
 0x67e   : > { %s2413_s16 = smov %s1916_s17  ;;  %s2414_s17 = smov %s2111_s14 }
 0x67f   : > { %s2415_s18 = smov %s2095_s9  ;;  %20 = sbr.rel (!%p18_p2) target bundleno = 6 (0x6), region = 89 }
 0x686   :  { %1353 = vsyncpa [#allocation4], 1 }
 0x687   :  { %1355 = vsyncpa [#allocation4 + $0x1], 1 }
 0x688   :  { %1356 = vsyncpa [#allocation7], 1 }
 0x689   :  { %1357 = vsyncpa [#allocation5], 1 }
 0x68a   :  { %1359 = vsyncpa [#allocation5 + $0x1], 1 }

</bundles_post_ra>
